<compile_context>
chip_gen: v6e
topology: v6e:2x2x1
jax: 0.10.0
libtpu: 0.0.40
codegen_flags: <defaults>
</compile_context>

<pallas_src>
import jax
import jax.numpy as jnp
from jax.experimental import pallas as pl
from jax.experimental.pallas import tpu as pltpu

# ----------------------------- configuration --------------------------------
N_NODES = 8            # atoms per graph
N_EDGES = 16           # directed bonds per graph
NODE_FEAT = 16         # arguments.node_feature_size
EDGE_FEAT = 8          # arguments.edge_feature_size
HIDDEN = 32            # hidden_size
GLOBAL_SIZE = 8        # global_size
NUM_TASKS = 1          # num_tasks
GNN_LAYERS = 2         # GNN_Layers
READOUT1_IN = HIDDEN + GLOBAL_SIZE                    # 40
READOUT1_OUT = READOUT1_IN + 50                       # 90
READOUT2_OUT = int(2 / 3 * READOUT1_OUT) + NUM_TASKS  # 61
OUT_PAD = 128          # lane-dense output width (only col 0 is the real task)

GRAPHS_PER_STEP = 16               # 16 graphs * 8 nodes = 128 stacked rows
NG = GRAPHS_PER_STEP * N_NODES     # 128 node rows per grid step
BATCH = 32                         # total graphs
GRID = BATCH // GRAPHS_PER_STEP    # 2 grid steps (both v7x TCs get work)

# ---- per-step node-data slab (NG, 32): lane layout -------------------------
X_COLS = NODE_FEAT + EDGE_FEAT + GLOBAL_SIZE   # 32
COL_FEAT = 0
COL_ME = NODE_FEAT                             # 16
COL_GLOB = NODE_FEAT + EDGE_FEAT               # 24 (globals broadcast per node)

# ---- packed weight slab layout (all offsets 16-row aligned for bf16 tiles) --
ROW_WI = 0        # (16, 32)
ROW_WMH = 16      # (32, 32)
ROW_WME = 48      # ( 8, 32)
ROW_WA = 64       # (48, 32)   fused linear_a weight
ROW_WR1 = 112     # (40, 90)   readout_1 weight (rows: [hidden | globals])
ROW_WR2 = 160     # (90, 61)
ROW_WR3 = 256     # (61, 128)  zero-padded output lanes
ROW_BI = 320
ROW_BM = 336
ROW_BA = 352
ROW_BR1 = 368
ROW_BR2 = 384
ROW_BR3 = 400
ROW_POOL = 416    # (16, 128)  per-graph mean-pooling matrix (rows of 1/8)
W_ROWS = 432
W_LANES = 128


# ------------------------------- kernel -------------------------------------
def gnn_kernel(a_ref, x_ref, w_ref, out_ref):
    f32 = jnp.float32
    bf16 = jnp.bfloat16
    relu = lambda x: jnp.maximum(x, 0.0)
    # MXU dot: bf16 operands (weights already bf16), f32 accumulation.
    mxu = lambda a, b: jnp.dot(a.astype(bf16), b, preferred_element_type=f32)

    # ---- per-step data (one 16-graph stack) ----
    A = a_ref[...]                                        # (NG, NG) bf16 block-diag
    v = x_ref[:, COL_FEAT:COL_FEAT + NODE_FEAT]           # (NG, Fn) f32
    Me = x_ref[:, COL_ME:COL_ME + EDGE_FEAT]              # (NG, Fe) f32
    gcols = x_ref[:, COL_GLOB:COL_GLOB + GLOBAL_SIZE]     # (NG, G)  globals bcast

    # ---- resident weight slab (static slices) ----
    wi = w_ref[ROW_WI:ROW_WI + NODE_FEAT, 0:HIDDEN]
    wmh = w_ref[ROW_WMH:ROW_WMH + HIDDEN, 0:HIDDEN]
    wme = w_ref[ROW_WME:ROW_WME + EDGE_FEAT, 0:HIDDEN]
    wa = w_ref[ROW_WA:ROW_WA + NODE_FEAT + HIDDEN, 0:HIDDEN]
    wr1 = w_ref[ROW_WR1:ROW_WR1 + READOUT1_IN, 0:READOUT1_OUT]
    wr2 = w_ref[ROW_WR2:ROW_WR2 + READOUT1_OUT, 0:READOUT2_OUT]
    wr3 = w_ref[ROW_WR3:ROW_WR3 + READOUT2_OUT, 0:OUT_PAD]
    pool = w_ref[ROW_POOL:ROW_POOL + GRAPHS_PER_STEP, 0:NG]     # (16, 128) bf16
    bi = w_ref[ROW_BI:ROW_BI + 1, 0:HIDDEN].astype(f32)
    bm = w_ref[ROW_BM:ROW_BM + 1, 0:HIDDEN].astype(f32)
    ba = w_ref[ROW_BA:ROW_BA + 1, 0:HIDDEN].astype(f32)
    br1 = w_ref[ROW_BR1:ROW_BR1 + 1, 0:READOUT1_OUT].astype(f32)
    br2 = w_ref[ROW_BR2:ROW_BR2 + 1, 0:READOUT2_OUT].astype(f32)
    br3 = w_ref[ROW_BR3:ROW_BR3 + 1, 0:OUT_PAD].astype(f32)

    # state_node_0: h_input = linear_i(v); h_0 = relu(h_input)
    h_input = mxu(v, wi) + bi                                   # (NG, H)
    h = relu(h_input)

    # loop-invariant part of the message update (edge-feature sum + biases)
    base = h_input + mxu(Me, wme) + bm                          # (NG, H)

    # message-passing layers (dropout p = 0 -> identity)
    for _ in range(GNN_LAYERS):
        agg = jnp.dot(A, h.astype(bf16), preferred_element_type=f32)   # (NG, H)
        h = relu(base + mxu(agg, wmh))

    # m_v[v] = sum over incoming edges of h[src]  ==  A_bd @ h
    m_v = jnp.dot(A, h.astype(bf16), preferred_element_type=f32)       # (NG, H)

    # h_v = relu(linear_a(concat(v, m_v)))   (fused weight, lane concat)
    h_v = relu(mxu(jnp.concatenate([v, m_v], axis=-1), wa) + ba)       # (NG, H)

    # readout_nodes(op='mean') per graph + concat(globals) in ONE pooling matmul:
    # pool rows are 1/8 on the graph's 8 node rows; globals columns are
    # constant across those rows, so their pooled mean is exactly the globals.
    pooled = jnp.dot(pool, jnp.concatenate([h_v, gcols], axis=-1).astype(bf16),
                     preferred_element_type=f32)                # (16, H+G)

    # batched readout MLP (task_type='Regression' -> no sigmoid)
    r1 = relu(mxu(pooled, wr1) + br1)                           # (16, 90)
    r2 = relu(mxu(r1, wr2) + br2)                               # (16, 61)
    r3 = mxu(r2, wr3) + br3                                     # (16, 128)

    out_ref[...] = r3                                           # full-vreg store


def gnn_forward(a_bd, x_slabs, w_slab):
    """a_bd: (GRID, NG, NG) bf16; x_slabs: (GRID, NG, 32) f32; w_slab: (432,128) bf16."""
    grid = a_bd.shape[0]
    out = pl.pallas_call(
        gnn_kernel,
        out_shape=jax.ShapeDtypeStruct((grid * GRAPHS_PER_STEP, OUT_PAD),
                                       jnp.float32),
        grid=(grid,),
        in_specs=[
            pl.BlockSpec((None, NG, NG), lambda i: (i, 0, 0)),
            pl.BlockSpec((None, NG, X_COLS), lambda i: (i, 0, 0)),
            pl.BlockSpec((W_ROWS, W_LANES), lambda i: (0, 0)),   # VMEM-resident
        ],
        out_specs=pl.BlockSpec((GRAPHS_PER_STEP, OUT_PAD), lambda i: (i, 0)),
        compiler_params=pltpu.CompilerParams(
            dimension_semantics=("parallel",)),
    )(a_bd, x_slabs, w_slab)
    return out[:, :NUM_TASKS]                                    # (B, T)


# --------------------------- host-side packing -------------------------------
def build_weight_slab(params):
    (Wi, bi, WmH, WmE, bm, Wa, ba, Wr1, br1, Wr2, br2, Wr3, br3) = params
    slab = jnp.zeros((W_ROWS, W_LANES), jnp.float32)
    slab = slab.at[ROW_WI:ROW_WI + NODE_FEAT, :HIDDEN].set(Wi)
    slab = slab.at[ROW_WMH:ROW_WMH + HIDDEN, :HIDDEN].set(WmH)
    slab = slab.at[ROW_WME:ROW_WME + EDGE_FEAT, :HIDDEN].set(WmE)
    slab = slab.at[ROW_WA:ROW_WA + NODE_FEAT + HIDDEN, :HIDDEN].set(Wa)
    slab = slab.at[ROW_WR1:ROW_WR1 + READOUT1_IN, :READOUT1_OUT].set(Wr1)
    slab = slab.at[ROW_WR2:ROW_WR2 + READOUT1_OUT, :READOUT2_OUT].set(Wr2)
    slab = slab.at[ROW_WR3:ROW_WR3 + READOUT2_OUT, :NUM_TASKS].set(Wr3)
    slab = slab.at[ROW_BI, :HIDDEN].set(bi[0])
    slab = slab.at[ROW_BM, :HIDDEN].set(bm[0])
    slab = slab.at[ROW_BA, :HIDDEN].set(ba[0])
    slab = slab.at[ROW_BR1, :READOUT1_OUT].set(br1[0])
    slab = slab.at[ROW_BR2, :READOUT2_OUT].set(br2[0])
    slab = slab.at[ROW_BR3, :NUM_TASKS].set(br3[0])
    # per-graph mean pooling matrix: P[g, n] = 1/8 if n belongs to graph g
    pool = jnp.repeat(jnp.eye(GRAPHS_PER_STEP, dtype=jnp.float32),
                      N_NODES, axis=1) / N_NODES                 # (16, 128)
    slab = slab.at[ROW_POOL:ROW_POOL + GRAPHS_PER_STEP, :NG].set(pool)
    return slab.astype(jnp.bfloat16)


def make_adj(src, dst):
    # A[n, m] = number of directed edges m -> n (multiplicities accumulate)
    return jnp.zeros((N_NODES, N_NODES), jnp.float32).at[dst, src].add(1.0)


def build_step_inputs(feats, efeats, srcs, dsts, globs):
    """feats:(B,8,16) efeats:(B,16,8) srcs/dsts:(B,16) globs:(B,1,8)."""
    A_all = jax.vmap(make_adj)(srcs, dsts)                       # (B, 8, 8)
    Me_all = jax.vmap(
        lambda e, d: jax.ops.segment_sum(e, d, num_segments=N_NODES)
    )(efeats, dsts)                                              # (B, 8, Fe)
    glob_b = jnp.broadcast_to(globs, (BATCH, N_NODES, GLOBAL_SIZE))
    x_all = jnp.concatenate([feats, Me_all, glob_b], axis=-1)    # (B, 8, 32)
    x_slabs = x_all.reshape(GRID, NG, X_COLS)                    # (GRID, 128, 32)

    def block_diag(a_graphs):                                    # (16,8,8)->(128,128)
        out = jnp.zeros((NG, NG), jnp.float32)
        for g in range(GRAPHS_PER_STEP):
            o = g * N_NODES
            out = out.at[o:o + N_NODES, o:o + N_NODES].set(a_graphs[g])
        return out

    a_bd = jnp.stack([
        block_diag(A_all[s * GRAPHS_PER_STEP:(s + 1) * GRAPHS_PER_STEP])
        for s in range(GRID)
    ]).astype(jnp.bfloat16)                                      # (GRID, 128, 128)
    return a_bd, x_slabs


# --------------------------- pure-JAX reference ------------------------------
# Mirrors the kernel's numerics: bf16 matmul operands, f32 accumulation,
# f32 elementwise, bf16-stored biases.
def gnn_reference(feat, efeat, src, dst, glob, params):
    bf16, f32 = jnp.bfloat16, jnp.float32
    br = lambda x: x.astype(bf16).astype(f32)
    bdot = lambda a, b: jnp.dot(a.astype(bf16), b.astype(bf16),
                                preferred_element_type=f32)
    relu = lambda x: jnp.maximum(x, 0.0)
    (Wi, bi, WmH, WmE, bm, Wa, ba, Wr1, br1, Wr2, br2, Wr3, br3) = params
    h_input = bdot(feat, Wi) + br(bi)
    h = relu(h_input)
    Me = jax.ops.segment_sum(efeat, dst, num_segments=N_NODES)
    base = h_input + bdot(Me, WmE) + br(bm)
    for _ in range(GNN_LAYERS):
        agg = jax.ops.segment_sum(br(h)[src], dst, num_segments=N_NODES)
        h = relu(base + bdot(agg, WmH))
    m_v = jax.ops.segment_sum(br(h)[src], dst, num_segments=N_NODES)
    h_v = relu(bdot(jnp.concatenate([feat, m_v], axis=-1), Wa) + br(ba))
    out_feat = jnp.mean(br(h_v), axis=0, keepdims=True)
    r1 = relu(bdot(jnp.concatenate([out_feat, glob], axis=-1), Wr1) + br(br1))
    r2 = relu(bdot(r1, Wr2) + br(br2))
    return bdot(r2, Wr3) + br(br3)                               # (1, T)


# ------------------------------- setup ---------------------------------------
def xavier_normal(key, shape_out_in):
    fan_out, fan_in = shape_out_in
    std = (2.0 / (fan_in + fan_out)) ** 0.5   # gain('linear') = 1
    return std * jax.random.normal(key, shape_out_in, dtype=jnp.float32)


def bias_init(key, fan_in, fan_out):
    bound = 1.0 / (fan_in ** 0.5)
    return jax.random.uniform(key, (1, fan_out), jnp.float32, -bound, bound)


if __name__ == "__main__":
    root = jax.random.PRNGKey(0)
    k_params, k_graphs = jax.random.split(root)
    pk = jax.random.split(k_params, 12)

    # parameters (PyTorch nn.Linear weight is (out, in); pre-transpose to (in, out))
    Wi = xavier_normal(pk[0], (HIDDEN, NODE_FEAT)).T
    bi = bias_init(pk[1], NODE_FEAT, HIDDEN)
    Wm = xavier_normal(pk[2], (HIDDEN, HIDDEN + EDGE_FEAT)).T      # (H+Fe, H)
    WmH, WmE = Wm[:HIDDEN], Wm[HIDDEN:]
    bm = bias_init(pk[3], HIDDEN + EDGE_FEAT, HIDDEN)
    Wa = xavier_normal(pk[4], (HIDDEN, NODE_FEAT + HIDDEN)).T      # (Fn+H, H)
    ba = bias_init(pk[5], NODE_FEAT + HIDDEN, HIDDEN)
    Wr1 = xavier_normal(pk[6], (READOUT1_OUT, READOUT1_IN)).T      # (H+G, R1)
    br1 = bias_init(pk[7], READOUT1_IN, READOUT1_OUT)
    Wr2 = xavier_normal(pk[8], (READOUT2_OUT, READOUT1_OUT)).T
    br2 = bias_init(pk[9], READOUT1_OUT, READOUT2_OUT)
    Wr3 = xavier_normal(pk[10], (NUM_TASKS, READOUT2_OUT)).T
    br3 = bias_init(pk[11], READOUT2_OUT, NUM_TASKS)

    params = (Wi, bi, WmH, WmE, bm, Wa, ba, Wr1, br1, Wr2, br2, Wr3, br3)
    w_slab = build_weight_slab(params)

    # batch of graphs
    kf, ke, kg, ks, kd = jax.random.split(k_graphs, 5)
    feats = jax.random.normal(kf, (BATCH, N_NODES, NODE_FEAT), jnp.float32)
    efeats = jax.random.normal(ke, (BATCH, N_EDGES, EDGE_FEAT), jnp.float32)
    globs = jax.random.normal(kg, (BATCH, 1, GLOBAL_SIZE), jnp.float32)
    srcs = jax.random.randint(ks, (BATCH, N_EDGES), 0, N_NODES)
    dsts = jax.random.randint(kd, (BATCH, N_EDGES), 0, N_NODES)

    a_bd, x_slabs = build_step_inputs(feats, efeats, srcs, dsts, globs)

    out = jax.jit(gnn_forward)(a_bd, x_slabs, w_slab)              # (B, T)
    out = jax.block_until_ready(out)

    ref_fn = jax.jit(jax.vmap(
        lambda f, e, s, d, g: gnn_reference(f, e, s, d, g, params)))
    ref = ref_fn(feats, efeats, srcs, dsts, globs)[:, 0, :]        # (B, T)
    ref = jax.block_until_ready(ref)

    assert out.shape == (BATCH, NUM_TASKS)
    assert jnp.allclose(out, ref, rtol=1e-2, atol=1e-2), (out, ref)
    print("KERNEL_OK")
</pallas_src>

<mosaic_0001>
module attributes {stable_mosaic.version = 11 : i64} {
  func.func @gnn_kernel(%arg0: i32, %arg1: memref<1x128x128xbf16, #tpu.memory_space<vmem>>, %arg2: memref<1x128x32xf32, #tpu.memory_space<vmem>>, %arg3: memref<432x128xbf16, #tpu.memory_space<vmem>>, %arg4: memref<16x128xf32, #tpu.memory_space<vmem>>) attributes {dimension_semantics = [#tpu.dimension_semantics<parallel>], iteration_bounds = array<i64: 2>, scalar_prefetch = 0 : i64, scratch_operands = 0 : i64, tpu.core_type = #tpu.core_type<tc>, window_params = [{transform_indices = @transform_0, window_bounds = array<i64: 1, 128, 128>}, {transform_indices = @transform_1, window_bounds = array<i64: 1, 128, 32>}, {pipeline_mode = #tpu.pipeline_mode<synchronous>, transform_indices = @transform_2, window_bounds = array<i64: 432, 128>}, {transform_indices = @transform_3, window_bounds = array<i64: 16, 128>}]} {
    %c0 = arith.constant 0 : index
    %c0_0 = arith.constant 0 : index
    %c0_1 = arith.constant 0 : index
    %0 = vector.load %arg1[%c0, %c0_0, %c0_1] : memref<1x128x128xbf16, #tpu.memory_space<vmem>>, vector<1x128x128xbf16>
    %1 = vector.shape_cast %0 : vector<1x128x128xbf16> to vector<128x128xbf16>
    %c0_2 = arith.constant 0 : index
    %c0_3 = arith.constant 0 : index
    %c0_4 = arith.constant 0 : index
    %2 = vector.load %arg2[%c0_2, %c0_3, %c0_4] : memref<1x128x32xf32, #tpu.memory_space<vmem>>, vector<1x128x16xf32>
    %3 = vector.shape_cast %2 : vector<1x128x16xf32> to vector<128x16xf32>
    %c0_5 = arith.constant 0 : index
    %c0_6 = arith.constant 0 : index
    %c16 = arith.constant 16 : index
    %4 = vector.load %arg2[%c0_5, %c0_6, %c16] : memref<1x128x32xf32, #tpu.memory_space<vmem>>, vector<1x128x8xf32>
    %5 = vector.shape_cast %4 : vector<1x128x8xf32> to vector<128x8xf32>
    %c0_7 = arith.constant 0 : index
    %c0_8 = arith.constant 0 : index
    %c24 = arith.constant 24 : index
    %6 = vector.load %arg2[%c0_7, %c0_8, %c24] : memref<1x128x32xf32, #tpu.memory_space<vmem>>, vector<1x128x8xf32>
    %7 = vector.shape_cast %6 : vector<1x128x8xf32> to vector<128x8xf32>
    %c0_9 = arith.constant 0 : index
    %c0_10 = arith.constant 0 : index
    %8 = vector.load %arg3[%c0_9, %c0_10] : memref<432x128xbf16, #tpu.memory_space<vmem>>, vector<16x32xbf16>
    %c16_11 = arith.constant 16 : index
    %c0_12 = arith.constant 0 : index
    %9 = vector.load %arg3[%c16_11, %c0_12] : memref<432x128xbf16, #tpu.memory_space<vmem>>, vector<32x32xbf16>
    %c48 = arith.constant 48 : index
    %c0_13 = arith.constant 0 : index
    %10 = vector.load %arg3[%c48, %c0_13] : memref<432x128xbf16, #tpu.memory_space<vmem>>, vector<8x32xbf16>
    %c64 = arith.constant 64 : index
    %c0_14 = arith.constant 0 : index
    %11 = vector.load %arg3[%c64, %c0_14] : memref<432x128xbf16, #tpu.memory_space<vmem>>, vector<48x32xbf16>
    %c112 = arith.constant 112 : index
    %c0_15 = arith.constant 0 : index
    %12 = vector.load %arg3[%c112, %c0_15] : memref<432x128xbf16, #tpu.memory_space<vmem>>, vector<40x90xbf16>
    %c160 = arith.constant 160 : index
    %c0_16 = arith.constant 0 : index
    %13 = vector.load %arg3[%c160, %c0_16] : memref<432x128xbf16, #tpu.memory_space<vmem>>, vector<90x61xbf16>
    %c256 = arith.constant 256 : index
    %c0_17 = arith.constant 0 : index
    %14 = vector.load %arg3[%c256, %c0_17] : memref<432x128xbf16, #tpu.memory_space<vmem>>, vector<61x128xbf16>
    %c416 = arith.constant 416 : index
    %c0_18 = arith.constant 0 : index
    %15 = vector.load %arg3[%c416, %c0_18] : memref<432x128xbf16, #tpu.memory_space<vmem>>, vector<16x128xbf16>
    %c320 = arith.constant 320 : index
    %c0_19 = arith.constant 0 : index
    %16 = vector.load %arg3[%c320, %c0_19] : memref<432x128xbf16, #tpu.memory_space<vmem>>, vector<1x32xbf16>
    %17 = arith.extf %16 : vector<1x32xbf16> to vector<1x32xf32>
    %c336 = arith.constant 336 : index
    %c0_20 = arith.constant 0 : index
    %18 = vector.load %arg3[%c336, %c0_20] : memref<432x128xbf16, #tpu.memory_space<vmem>>, vector<1x32xbf16>
    %19 = arith.extf %18 : vector<1x32xbf16> to vector<1x32xf32>
    %c352 = arith.constant 352 : index
    %c0_21 = arith.constant 0 : index
    %20 = vector.load %arg3[%c352, %c0_21] : memref<432x128xbf16, #tpu.memory_space<vmem>>, vector<1x32xbf16>
    %21 = arith.extf %20 : vector<1x32xbf16> to vector<1x32xf32>
    %c368 = arith.constant 368 : index
    %c0_22 = arith.constant 0 : index
    %22 = vector.load %arg3[%c368, %c0_22] : memref<432x128xbf16, #tpu.memory_space<vmem>>, vector<1x90xbf16>
    %23 = arith.extf %22 : vector<1x90xbf16> to vector<1x90xf32>
    %c384 = arith.constant 384 : index
    %c0_23 = arith.constant 0 : index
    %24 = vector.load %arg3[%c384, %c0_23] : memref<432x128xbf16, #tpu.memory_space<vmem>>, vector<1x61xbf16>
    %25 = arith.extf %24 : vector<1x61xbf16> to vector<1x61xf32>
    %c400 = arith.constant 400 : index
    %c0_24 = arith.constant 0 : index
    %26 = vector.load %arg3[%c400, %c0_24] : memref<432x128xbf16, #tpu.memory_space<vmem>>, vector<1x128xbf16>
    %27 = arith.extf %26 : vector<1x128xbf16> to vector<1x128xf32>
    %28 = arith.truncf %3 : vector<128x16xf32> to vector<128x16xbf16>
    %cst = arith.constant dense<0.000000e+00> : vector<128x32xf32>
    %29 = tpu.matmul %28, %8, %cst {dimension_numbers = #tpu.dot_dimension_numbers<[1], [0], [0], [1], [0, 0, 1, 1], [], []>} : vector<128x16xbf16>, vector<16x32xbf16>, vector<128x32xf32> -> vector<128x32xf32>
    %30 = vector.broadcast %17 : vector<1x32xf32> to vector<128x32xf32>
    %31 = arith.addf %29, %30 : vector<128x32xf32>
    %cst_25 = arith.constant 0.000000e+00 : f32
    %32 = vector.broadcast %cst_25 : f32 to vector<128x32xf32>
    %33 = arith.maximumf %31, %32 : vector<128x32xf32>
    %34 = arith.truncf %5 : vector<128x8xf32> to vector<128x8xbf16>
    %cst_26 = arith.constant dense<0.000000e+00> : vector<128x32xf32>
    %35 = tpu.matmul %34, %10, %cst_26 {dimension_numbers = #tpu.dot_dimension_numbers<[1], [0], [0], [1], [0, 0, 1, 1], [], []>} : vector<128x8xbf16>, vector<8x32xbf16>, vector<128x32xf32> -> vector<128x32xf32>
    %36 = arith.addf %31, %35 : vector<128x32xf32>
    %37 = vector.broadcast %19 : vector<1x32xf32> to vector<128x32xf32>
    %38 = arith.addf %36, %37 : vector<128x32xf32>
    %39 = arith.truncf %33 : vector<128x32xf32> to vector<128x32xbf16>
    %cst_27 = arith.constant dense<0.000000e+00> : vector<128x32xf32>
    %40 = tpu.matmul %1, %39, %cst_27 {dimension_numbers = #tpu.dot_dimension_numbers<[1], [0], [0], [1], [0, 0, 1, 1], [], []>} : vector<128x128xbf16>, vector<128x32xbf16>, vector<128x32xf32> -> vector<128x32xf32>
    %41 = arith.truncf %40 : vector<128x32xf32> to vector<128x32xbf16>
    %cst_28 = arith.constant dense<0.000000e+00> : vector<128x32xf32>
    %42 = tpu.matmul %41, %9, %cst_28 {dimension_numbers = #tpu.dot_dimension_numbers<[1], [0], [0], [1], [0, 0, 1, 1], [], []>} : vector<128x32xbf16>, vector<32x32xbf16>, vector<128x32xf32> -> vector<128x32xf32>
    %43 = arith.addf %38, %42 : vector<128x32xf32>
    %cst_29 = arith.constant 0.000000e+00 : f32
    %44 = vector.broadcast %cst_29 : f32 to vector<128x32xf32>
    %45 = arith.maximumf %43, %44 : vector<128x32xf32>
    %46 = arith.truncf %45 : vector<128x32xf32> to vector<128x32xbf16>
    %cst_30 = arith.constant dense<0.000000e+00> : vector<128x32xf32>
    %47 = tpu.matmul %1, %46, %cst_30 {dimension_numbers = #tpu.dot_dimension_numbers<[1], [0], [0], [1], [0, 0, 1, 1], [], []>} : vector<128x128xbf16>, vector<128x32xbf16>, vector<128x32xf32> -> vector<128x32xf32>
    %48 = arith.truncf %47 : vector<128x32xf32> to vector<128x32xbf16>
    %cst_31 = arith.constant dense<0.000000e+00> : vector<128x32xf32>
    %49 = tpu.matmul %48, %9, %cst_31 {dimension_numbers = #tpu.dot_dimension_numbers<[1], [0], [0], [1], [0, 0, 1, 1], [], []>} : vector<128x32xbf16>, vector<32x32xbf16>, vector<128x32xf32> -> vector<128x32xf32>
    %50 = arith.addf %38, %49 : vector<128x32xf32>
    %cst_32 = arith.constant 0.000000e+00 : f32
    %51 = vector.broadcast %cst_32 : f32 to vector<128x32xf32>
    %52 = arith.maximumf %50, %51 : vector<128x32xf32>
    %53 = arith.truncf %52 : vector<128x32xf32> to vector<128x32xbf16>
    %cst_33 = arith.constant dense<0.000000e+00> : vector<128x32xf32>
    %54 = tpu.matmul %1, %53, %cst_33 {dimension_numbers = #tpu.dot_dimension_numbers<[1], [0], [0], [1], [0, 0, 1, 1], [], []>} : vector<128x128xbf16>, vector<128x32xbf16>, vector<128x32xf32> -> vector<128x32xf32>
    %55 = tpu.concatenate %3, %54 in 1 : vector<128x16xf32>, vector<128x32xf32> -> vector<128x48xf32>
    %56 = arith.truncf %55 : vector<128x48xf32> to vector<128x48xbf16>
    %cst_34 = arith.constant dense<0.000000e+00> : vector<128x32xf32>
    %57 = tpu.matmul %56, %11, %cst_34 {dimension_numbers = #tpu.dot_dimension_numbers<[1], [0], [0], [1], [0, 0, 1, 1], [], []>} : vector<128x48xbf16>, vector<48x32xbf16>, vector<128x32xf32> -> vector<128x32xf32>
    %58 = vector.broadcast %21 : vector<1x32xf32> to vector<128x32xf32>
    %59 = arith.addf %57, %58 : vector<128x32xf32>
    %cst_35 = arith.constant 0.000000e+00 : f32
    %60 = vector.broadcast %cst_35 : f32 to vector<128x32xf32>
    %61 = arith.maximumf %59, %60 : vector<128x32xf32>
    %62 = tpu.concatenate %61, %7 in 1 : vector<128x32xf32>, vector<128x8xf32> -> vector<128x40xf32>
    %63 = arith.truncf %62 : vector<128x40xf32> to vector<128x40xbf16>
    %cst_36 = arith.constant dense<0.000000e+00> : vector<16x40xf32>
    %64 = tpu.matmul %15, %63, %cst_36 {dimension_numbers = #tpu.dot_dimension_numbers<[1], [0], [0], [1], [0, 0, 1, 1], [], []>} : vector<16x128xbf16>, vector<128x40xbf16>, vector<16x40xf32> -> vector<16x40xf32>
    %65 = arith.truncf %64 : vector<16x40xf32> to vector<16x40xbf16>
    %cst_37 = arith.constant dense<0.000000e+00> : vector<16x90xf32>
    %66 = tpu.matmul %65, %12, %cst_37 {dimension_numbers = #tpu.dot_dimension_numbers<[1], [0], [0], [1], [0, 0, 1, 1], [], []>} : vector<16x40xbf16>, vector<40x90xbf16>, vector<16x90xf32> -> vector<16x90xf32>
    %67 = vector.broadcast %23 : vector<1x90xf32> to vector<16x90xf32>
    %68 = arith.addf %66, %67 : vector<16x90xf32>
    %cst_38 = arith.constant 0.000000e+00 : f32
    %69 = vector.broadcast %cst_38 : f32 to vector<16x90xf32>
    %70 = arith.maximumf %68, %69 : vector<16x90xf32>
    %71 = arith.truncf %70 : vector<16x90xf32> to vector<16x90xbf16>
    %cst_39 = arith.constant dense<0.000000e+00> : vector<16x61xf32>
    %72 = tpu.matmul %71, %13, %cst_39 {dimension_numbers = #tpu.dot_dimension_numbers<[1], [0], [0], [1], [0, 0, 1, 1], [], []>} : vector<16x90xbf16>, vector<90x61xbf16>, vector<16x61xf32> -> vector<16x61xf32>
    %73 = vector.broadcast %25 : vector<1x61xf32> to vector<16x61xf32>
    %74 = arith.addf %72, %73 : vector<16x61xf32>
    %cst_40 = arith.constant 0.000000e+00 : f32
    %75 = vector.broadcast %cst_40 : f32 to vector<16x61xf32>
    %76 = arith.maximumf %74, %75 : vector<16x61xf32>
    %77 = arith.truncf %76 : vector<16x61xf32> to vector<16x61xbf16>
    %cst_41 = arith.constant dense<0.000000e+00> : vector<16x128xf32>
    %78 = tpu.matmul %77, %14, %cst_41 {dimension_numbers = #tpu.dot_dimension_numbers<[1], [0], [0], [1], [0, 0, 1, 1], [], []>} : vector<16x61xbf16>, vector<61x128xbf16>, vector<16x128xf32> -> vector<16x128xf32>
    %79 = vector.broadcast %27 : vector<1x128xf32> to vector<16x128xf32>
    %80 = arith.addf %78, %79 : vector<16x128xf32>
    %c0_42 = arith.constant 0 : index
    %c0_43 = arith.constant 0 : index
    %81 = vector.load %arg4[%c0_42, %c0_43] : memref<16x128xf32, #tpu.memory_space<vmem>>, vector<16x128xf32>
    tpu.vector_store %arg4[%c0_42, %c0_43], %80 {strides = array<i32>} : memref<16x128xf32, #tpu.memory_space<vmem>>, vector<16x128xf32>,
    return
  }
  func.func @transform_0(%arg0: i32) -> (i32, i32, i32) {
    %c0_i32 = arith.constant 0 : i32
    %c0_i32_0 = arith.constant 0 : i32
    %c0_i32_1 = arith.constant 0 : i32
    return %arg0, %c0_i32, %c0_i32_0 : i32, i32, i32
  }
  func.func @transform_1(%arg0: i32) -> (i32, i32, i32) {
    %c0_i32 = arith.constant 0 : i32
    %c0_i32_0 = arith.constant 0 : i32
    %c0_i32_1 = arith.constant 0 : i32
    return %arg0, %c0_i32, %c0_i32_0 : i32, i32, i32
  }
  func.func @transform_2(%arg0: i32) -> (i32, i32) {
    %c0_i32 = arith.constant 0 : i32
    %c0_i32_0 = arith.constant 0 : i32
    %c0_i32_1 = arith.constant 0 : i32
    return %c0_i32, %c0_i32_0 : i32, i32
  }
  func.func @transform_3(%arg0: i32) -> (i32, i32) {
    %c0_i32 = arith.constant 0 : i32
    %c0_i32_0 = arith.constant 0 : i32
    return %arg0, %c0_i32 : i32, i32
  }
}

</mosaic_0001>

<bundles_post_ra>
// kernel: gnn_forward.1
= control target key start
LH: loop header
LB: loop body
LE: loop exit
PB: predicated region body
PF: predicated region fallthrough
CT: control target
= control target key end

     0   :  { %8 = vsyncpa [#allocation3], 0  ;;  %s3412_s0 = inlined_call_operand.hbm [shape: bf16[2,128,128], index: 0, kind: input, shape index: {}]   ;;  %s3413_s1 = inlined_call_operand.vmem [shape: f32[2,128,32], index: 1, kind: input, shape index: {}]   ;;  %s3414_s2 = inlined_call_operand.vmem [shape: bf16[432,128], index: 2, kind: input, shape index: {}]   ;;  %s3415_s3 = inlined_call_operand.vmem [shape: f32[32,128], index: 3, kind: output, shape index: {}]  }
   0x1   :  { %10 = vsyncpa [#allocation3 + $0x1], 0  ;;  %s2769_s12 = smov 0   ;;  %s2771_s13 = smov 0  }
   0x2   :  { %s2773_s14 = smov 0   ;;  %s2775_s15 = smov 0  }
   0x3 LB: > { %s2788_s16 = sadd.s32 4294967295, %s2738_s15   ;;  %s2791_s17 = sadd.s32 1, %s2738_s15   ;;  %s2738_s15 = sphi %s2775_s15, %s3433_s15   ;;  %s2734_s14 = sphi %s2773_s14, %s3432_s14   ;;  %s2730_s13 = sphi %s2771_s13, %s3431_s13   ;;  %s2726_s12 = sphi %s2769_s12, %s3430_s12  }
   0x4   : > { %s20_s18 = ssub.s32 %s2738_s15, %s2791_s17  ;;  %s23_s19 = sadd.s32 1, %s2734_s14 }
   0x5   : > { %p21_p0 = scmp.eq.s32.totalorder %s20_s18, 0  ;;  %p30_p1 = scmp.ne.s32.totalorder %s2734_s14, %s2730_s13 }
   0x6   : > { %p31_p2 = scmp.eq.s32.totalorder %s2738_s15, 0  ;;  %p36_p3 = scmp.ne.s32.totalorder %s2730_s13, %s2726_s12 }
   0x7   : > { %s2801_s20 = scalar_select %p21_p0, %s2734_s14, %s23_s19  }
   0x8   : > { %p32_p4 = por %p31_p2, %p30_p1  ;;  %p37_p5 = scmp.eq.s32.totalorder %s2788_s16, 0 }
   0x9   : > { %p2511_p6 = scmp.lt.s32.totalorder %s2738_s15, 2  ;;  %s136_s22 = sand.u32 1, %s2734_s14  }
   0xa   : > { %p2805_p7 = por %p37_p5, %p36_p3  ;;  %s2046_s23 = sshll.u32 %s136_s22, 6 }
   0xb   : > { %s2128_s24 = sshll.u32 %s2738_s15, 10  ;;  %s140_s28 = scalar_lea.vmem [#allocation2], %s2046_s23 }
   0xc   : > { %s3420_s21 = scalar_select %p2805_p7, 1, 0 }
   0xd   : > { %s2814_s27 = scalar_lea.hbm %s3412_s0, %s2128_s24  ;;  %s147_s29 = sshll.u32 %s140_s28, 4  ;;  %s2816_s29 = int_to_ptr.vmem [resolvable:$true] %s147_s29 }
   0xe   : > { %p2818_p8 = pnand %p2511_p6, %p32_p4  ;;  %s2823_s4 = scalar_lea.sflag [#allocation3], %s136_s22 }
   0xf   : > { %s2676_s5 = scalar_lea.hbm %s2814_s27, 1024  ;;  %s2681_s8 = scalar_lea.hbm %s3412_s0, 2048 }
  0x10   : > { %p2677_p10 = scmp.ne.s32.totalorder %s2814_s27, %s2676_s5  ;;  %p2678_p11 = pneg %p2818_p8 }
  0x11   : > { %p2682_p0 = scmp.lt.s32.totalorder %s2814_s27, %s3412_s0  ;;  %p2683_p1 = scmp.lt.s32.totalorder %s2681_s8, %s2676_s5 }
  0x12   : > { %p2679_p12 = pnand %p2678_p11, %p2677_p10 }
  0x13   : > { %p2684_p2 = por %p2683_p1, %p2682_p0 }
  0x14   : > { %p2680_p13 = pneg %p2679_p12 }
  0x16   : > { %p2685_p3 = pnand %p2684_p2, %p2680_p13 }
  0x18   : > { %2688 = shalt.err (!%p2685_p3)
}
  0x19   : > { %s2689_s11 = scalar_lea.vmem %s2816_s29, 1024  ;;  %s2740_s12 = smov [#allocation2]  }
  0x1a   : > { %p2690_p4 = scmp.ne.s32.totalorder %s2816_s29, %s2689_s11  ;;  %s2694_s18 = sshll.u32 %s2740_s12, 4  ;;  %s2695_s18 = int_to_ptr.vmem [resolvable:$false] %s2694_s18 }
  0x1b   : > { %s2696_s19 = scalar_lea.vmem %s2695_s18, 2048  ;;  %p2697_p10 = scmp.lt.s32.totalorder %s2816_s29, %s2695_s18 }
  0x1c   : > { %p2692_p5 = pnand %p2690_p4, %p2678_p11  ;;  %p2698_p12 = scmp.lt.s32.totalorder %s2696_s19, %s2689_s11 }
  0x1e   : > { %p2693_p6 = pneg %p2692_p5  ;;  %p2699_p9 = por %p2698_p12, %p2697_p10 }
  0x20   : > { %p2700_p7 = pnand %p2699_p9, %p2693_p6 }
  0x22   : > { %2703 = shalt.err (!%p2700_p7)
}
  0x23   : > { %s2741_s22 = smov 64   ;;  %s2742_s23 = smov 4  }
  0x24   : > { %2510 = dma.hbm_to_vmem [thread:$0]  (!%p2818_p8), %s2814_s27, 1024, %s2816_s29, %s2823_s4, %s2741_s22, %s2741_s22, %s2742_s23  }
  0x25   : > { %p163_p11 = scmp.lt.s32.totalorder %s2738_s15, 3  ;;  %p3422_p13 = scmp.ge.s32.totalorder %s2738_s15, 1 }
  0x27   : > { %p164_p0 = pnand %p3422_p13, %p163_p11 }
  0x29   : > { %167 = sbr.rel (%p164_p0) target bundleno = 2627 (0xa43), region = 32 }
  0x2e   : > { %s169_s24 = sand.u32 1, %s2730_s13   ;;  %p3423_p7 = scmp.ne.s32.totalorder %s3420_s21, 0 }
  0x2f   : > { %s2050_s25 = sshll.u32 %s169_s24, 6  ;;  %s170_s26 = scalar_lea.sflag [#allocation3], %s169_s24 }
  0x30   : > { %s2848_s28 = scalar_lea.vmem [#allocation2], %s2050_s25 }
  0x31   : > { %2721 = dma.done.wait (%p3423_p7), %s170_s26, 1024  }
  0x32   : > { %2723 = vsyncadd (%p3423_p7), %s170_s26, 4294966272  ;;  %p201_p9 = scmp.lt.s32.totalorder %s2788_s16, 1  ;;  %v2632_v0 = vld [vmem:[%s3414_s2] sm:$0xff]   ;;  %vm315_vm0 = vcmask 130048   ;;  %s2743_s21 = smov 112   ;;  %vm502_vm1 = vcmask 1043456   ;;  %v305_v43 = vlaneseq }
  0x33   : > { %2252 = vmatprep.subr.bf16.mxu0 %v2632_v0  ;;  %v251_v17 = vld [vmem:[%s3414_s2 + $0x18] sm:$0xf]  ;;  %vm477_vm2 = vcmask 64512   ;;  %v2916_v32 = vld [vmem:[%s2848_s28] sm:$0xff]   ;;  %v2934_v50 = vld [vmem:[%s3414_s2 + $0x10] sm:$0xff]   ;;  %vm812_vm3 = vcmask 261120  }
  0x34   : > { %s202_s27 = scalar_select %p201_p9, %s2788_s16, 1  ;;  %2253 = vmatpush3.bf16.msra.mxu0 %v2632_v0  ;;  %2504 = vmatprep.subr.msk.bf16.mxu1 %vm502_vm1, %v251_v17  ;;  %v504_v20 = vsel %vm502_vm1, %v251_v17, 0  ;;  %v306_v46 = vshrl.u32 %v305_v43, 7  ;;  %v285_v47 = vld [vmem:[%s3414_s2 + $0xa0] sm:$0x1]  ;;  %v2939_v51 = vld [vmem:[%s3414_s2 + $0x8] sm:$0xff]  }
  0x35   : > { %2271 = vmatpush3.bf16.msra.mxu1 %v504_v20  ;;  %v286_v52 = vunpack.c.l.bf16 %v285_v47  ;;  %v3012_v43 = vld [vmem:[%s2848_s28 + $0x20] sm:$0xff]   ;;  %s2744_s15 = smov 16   ;;  %s2745_s30 = smov 8   ;;  %vm1447_vm4 = vcmask 392192   ;;  %vm2747_vm5 = vmmov 0   ;;  %vm1834_vm6 = vcmask 1044480  }
  0x36   : > { %s2129_s29 = sshll.u32 %s202_s27, 7  ;;  %v2941_v53 = vsub.s32 0, %v306_v46  ;;  %2320 = vmatprep.subr.bf16.mxu1 %v2934_v50  ;;  %v3025_v46 = vld [vmem:[%s2848_s28 + $0x38] sm:$0xff]   ;;  %vm1740_vm7 = vcmask 326656   ;;  %vm1913_vm8 = vcmask 1045504   ;;  %vm1914_vm9 = vcmask 1046528  }
  0x37   : > { %s2859_s4 = scalar_lea.vmem %s3413_s1, %s2129_s29  ;;  %vm1830_vm10 = vcmask 736256   ;;  %vm1909_vm11 = vcmask 498688   ;;  %s2053_s22 = sshll.u32 %s2788_s16, 1 }
  0x38   : > { %v229_v1 = vld [vmem:[%s2859_s4] sm:$0xff]  ;;  %v230_v2 = vld [vmem:[%s2859_s4 + $0x8] sm:$0xff]  ;;  %v231_v3 = vld [vmem:[%s2859_s4 + $0x10] sm:$0xff]  ;;  %v308_v56 = vrot.slane %v286_v52, %v2941_v53  ;;  %p207_p8 = scmp.lt.s32.totalorder %s2053_s22, 3 }
  0x39   : > { %v297_v4 = vpack.c.bf16 %v230_v2, %v229_v1  ;;  %v232_v5 = vld [vmem:[%s2859_s4 + $0x18] sm:$0xff]  ;;  %v233_v6 = vld [vmem:[%s2859_s4 + $0x20] sm:$0xff]  ;;  %v234_v7 = vld [vmem:[%s2859_s4 + $0x28] sm:$0xff] }
  0x3a   : > { %v298_v8 = vpack.c.bf16 %v232_v5, %v231_v3  ;;  %v299_v9 = vpack.c.bf16 %v234_v7, %v233_v6  ;;  %v235_v10 = vld [vmem:[%s2859_s4 + $0x30] sm:$0xff]  ;;  %v236_v11 = vld [vmem:[%s2859_s4 + $0x38] sm:$0xff]  ;;  %v237_v13 = vld [vmem:[%s2859_s4 + $0x40] sm:$0xff]  ;;  %s3435_s22 = smov (!%p207_p8, %s2053_s22), 3 }
  0x3b   : > { %461 = vrot.lane.b32.xlu0 %v297_v4, %s2743_s21  ;;  %2254 = vmatprep.mubr.msk.bf16.mxu0 %vm315_vm0, %v297_v4  ;;  %v300_v12 = vpack.c.bf16 %v236_v11, %v235_v10  ;;  %v238_v14 = vld [vmem:[%s2859_s4 + $0x48] sm:$0xff]  ;;  %v239_v15 = vld [vmem:[%s2859_s4 + $0x50] sm:$0xff]  ;;  %v240_v16 = vld [vmem:[%s2859_s4 + $0x58] sm:$0xff]  ;;  %s2054_s25 = sshll.u32 %s3435_s22, 3 }
  0x3c   : > { %465 = vrot.lane.b32.xlu1 %v299_v9, %s2743_s21  ;;  %2255 = vmatmul.mubr.msk.bf16.vlgmr.msra.gmra.mxu0 %vm315_vm0, %v298_v8  ;;  %v241_v18 = vld [vmem:[%s2859_s4 + $0x60] sm:$0xff]  ;;  %v2886_v19 = vld [vmem:[%s2859_s4 + $0x68] sm:$0xff]  ;;  %v301_v21 = vpack.c.bf16 %v238_v14, %v237_v13  ;;  %v2892_v22 = vld [vmem:[%s2859_s4 + $0x70] sm:$0xff]  ;;  %v302_v24 = vpack.c.bf16 %v240_v16, %v239_v15  ;;  %s210_s27 = scalar_lea.vmem %s3415_s3, %s2054_s25 }
  0x3d   : > { %2258 = vmatprep.mubr.msk.bf16.mxu0 %vm315_vm0, %v299_v9  ;;  %3424 = vst [vmem:[#allocation5_spill] sm:$0xff] %v2886_v19  ;;  %3425 = vst [vmem:[#allocation6_spill] sm:$0xff] %v2892_v22  ;;  %v2895_v23 = vld [vmem:[%s2859_s4 + $0x78] sm:$0xff]  ;;  %v303_v25 = vpack.c.bf16 %v2886_v19, %v241_v18 }
  0x3e   : > { %3426 = vst [vmem:[#allocation7_spill] sm:$0xff] %v2895_v23  ;;  %v304_v26 = vpack.c.bf16 %v2895_v23, %v2892_v22 }
  0x3f   : > { %463 = vrot.lane.b32.xlu0 %v298_v8, %s2743_s21 }
  0x40   : > { %467 = vrot.lane.b32.xlu1 %v300_v12, %s2743_s21 }
  0x43   : > { %469 = vrot.lane.b32.xlu0 %v301_v21, %s2743_s21 }
  0x44   : > { %471 = vrot.lane.b32.xlu1 %v302_v24, %s2743_s21  ;;  %2259 = vmatmul.mubr.msk.bf16.gmra.mxu0 %vm315_vm0, %v300_v12 }
  0x45   : > { %2262 = vmatprep.mubr.msk.bf16.mxu0 %vm315_vm0, %v301_v21 }
  0x47   : > { %473 = vrot.lane.b32.xlu0 %v303_v25, %s2743_s21 }
  0x48   : > { %475 = vrot.lane.b32.xlu1 %v304_v26, %s2743_s21 }
  0x4c   : > { %2263 = vmatmul.mubr.msk.bf16.gmra.mxu0 %vm315_vm0, %v302_v24 }
  0x4d   : > { %2266 = vmatprep.mubr.msk.bf16.mxu0 %vm315_vm0, %v303_v25 }
  0x54   : > { %2267 = vmatmul.mubr.msk.bf16.gmra.mxu0 %vm315_vm0, %v304_v26 }
  0x55   : > { %2304 = vmatprep.mubr.bf16.mxu0 %v2916_v32 }
  0xad   : > { %v462_v27 = vpop.permute.xlu0 %461 }
  0xae   : > { %2272 = vmatprep.mubr.msk.bf16.mxu1 %vm477_vm2, %v462_v27  ;;  %v466_v29 = vpop.permute.xlu1 %465 }
  0xb1   : > { %v464_v28 = vpop.permute.xlu0 %463 }
  0xb2   : > { %2273 = vmatmul.mubr.msk.bf16.vlgmr.msra.gmra.mxu1 %vm477_vm2, %v464_v28  ;;  %v468_v30 = vpop.permute.xlu1 %467 }
  0xb3   : > { %2276 = vmatprep.mubr.msk.bf16.mxu1 %vm477_vm2, %v466_v29  ;;  %2321 = vmatpush3.bf16.msra.mxu1 %v2934_v50 }
  0xb4   : > { %2322 = vmatprep.subr.bf16.mxu1 %v2939_v51 }
  0xb5   : > { %v470_v31 = vpop.permute.xlu0 %469 }
  0xb6   : > { %v472_v33 = vpop.permute.xlu1 %471 }
  0xb7   : > { %2323 = vmatpush3.bf16.msra.mxu1 %v2939_v51 }
  0xb8   : > { %2372 = vmatprep.subr.bf16.mxu1 %v2934_v50 }
  0xb9   : > { %v474_v34 = vpop.permute.xlu0 %473 }
  0xba   : > { %2277 = vmatmul.mubr.msk.bf16.gmra.mxu1 %vm477_vm2, %v468_v30  ;;  %v476_v35 = vpop.permute.xlu1 %475 }
  0xbb   : > { %2280 = vmatprep.mubr.msk.bf16.mxu1 %vm477_vm2, %v470_v31 }
  0xc2   : > { %2281 = vmatmul.mubr.msk.bf16.gmra.mxu1 %vm477_vm2, %v472_v33 }
  0xc3   : > { %2284 = vmatprep.mubr.msk.bf16.mxu1 %vm477_vm2, %v474_v34 }
  0xca   : > { %2285 = vmatmul.mubr.msk.bf16.gmra.mxu1 %vm477_vm2, %v476_v35 }
  0xfc   : > { %v2922_v36 = vpop.f32.mrf.mxu0 }
  0xfd   : > { %v2987_v28 = vadd.f32 %v2922_v36, %v308_v56 }
  0xfe   : > { %v2924_v37 = vpop.f32.mrf.mxu0 }
  0xff   : > { %v439_v34 = vmax.f32 %v2987_v28, 0.0  ;;  %v2996_v35 = vadd.f32 %v2924_v37, %v308_v56  ;;  %v3004_v37 = vld [vmem:[%s2848_s28 + $0x10] sm:$0xff]  }
 0x100   : > { %v2257_v38 = vpop.f32.mrf.mxu0 }
 0x101   : > { %v2983_v25 = vadd.f32 %v2257_v38, %v308_v56 }
 0x102   : > { %v2926_v39 = vpop.f32.mrf.mxu0 }
 0x103   : > { %v440_v30 = vmax.f32 %v2983_v25, 0.0  ;;  %v2992_v31 = vadd.f32 %v2926_v39, %v308_v56  ;;  %v437_v39 = vmax.f32 %v2996_v35, 0.0 }
 0x104   : > { %v2260_v40 = vpop.f32.mrf.mxu0 }
 0x105   : > { %v2974_v15 = vadd.f32 %v2260_v40, %v308_v56  ;;  %v438_v36 = vmax.f32 %v2992_v31, 0.0  ;;  %v640_v38 = vpack.c.bf16 %v440_v30, %v439_v34 }
 0x106   : > { %v390_v41 = vpop.f32.mrf.mxu0 }
 0x107   : > { %v443_v21 = vmax.f32 %v2974_v15, 0.0  ;;  %v2981_v24 = vadd.f32 %v390_v41, %v308_v56  ;;  %v639_v40 = vpack.c.bf16 %v438_v36, %v437_v39  ;;  %v3001_v41 = vld [vmem:[%s2848_s28 + $0x8] sm:$0xff]  }
 0x108   : > { %v2261_v42 = vpop.f32.mrf.mxu0 }
 0x109   : > { %v2971_v12 = vadd.f32 %v2261_v42, %v308_v56  ;;  %v441_v29 = vmax.f32 %v2981_v24, 0.0  ;;  %v3009_v42 = vld [vmem:[%s2848_s28 + $0x18] sm:$0xff]  }
 0x10a   : > { %v393_v44 = vpop.f32.mrf.mxu0 }
 0x10b   : > { %v444_v17 = vmax.f32 %v2971_v12, 0.0  ;;  %v2978_v18 = vadd.f32 %v393_v44, %v308_v56  ;;  %v3017_v44 = vld [vmem:[%s2848_s28 + $0x28] sm:$0xff]  }
 0x10c   : > { %v2264_v45 = vpop.f32.mrf.mxu0 }
 0x10d   : > { %v2961_v3 = vadd.f32 %v2264_v45, %v308_v56  ;;  %v442_v26 = vmax.f32 %v2978_v18, 0.0  ;;  %v642_v27 = vpack.c.bf16 %v444_v17, %v443_v21  ;;  %v3020_v45 = vld [vmem:[%s2848_s28 + $0x30] sm:$0xff]  }
 0x10e   : > { %v406_v48 = vpop.f32.mrf.mxu0 }
 0x10f   : > { %v447_v10 = vmax.f32 %v2961_v3, 0.0  ;;  %v2969_v11 = vadd.f32 %v406_v48, %v308_v56  ;;  %v641_v33 = vpack.c.bf16 %v442_v26, %v441_v29 }
 0x110   : > { %v2265_v49 = vpop.f32.mrf.mxu0 }
 0x111   : > { %v2955_v63 = vadd.f32 %v2265_v49, %v308_v56  ;;  %v445_v16 = vmax.f32 %v2969_v11, 0.0 }
 0x112   : > { %v409_v54 = vpop.f32.mrf.mxu0 }
 0x113   : > { %v448_v7 = vmax.f32 %v2955_v63, 0.0  ;;  %v2966_v8 = vadd.f32 %v409_v54, %v308_v56 }
 0x114   : > { %v2268_v55 = vpop.f32.mrf.mxu0 }
 0x115   : > { %v2947_v58 = vadd.f32 %v2268_v55, %v308_v56  ;;  %v446_v13 = vmax.f32 %v2966_v8, 0.0  ;;  %v644_v14 = vpack.c.bf16 %v448_v7, %v447_v10 }
 0x116   : > { %v422_v57 = vpop.f32.mrf.mxu0 }
 0x117   : > { %v2951_v60 = vadd.f32 %v422_v57, %v308_v56  ;;  %v451_v0 = vmax.f32 %v2947_v58, 0.0  ;;  %v643_v20 = vpack.c.bf16 %v446_v13, %v445_v16 }
 0x118   : > { %v2269_v59 = vpop.f32.mrf.mxu0 }
 0x119   : > { %v2953_v61 = vadd.f32 %v2269_v59, %v308_v56  ;;  %v449_v4 = vmax.f32 %v2951_v60, 0.0 }
 0x11a   : > { %v425_v62 = vpop.f32.mrf.mxu0 }
 0x11b   : > { %v452_v1 = vmax.f32 %v2953_v61, 0.0  ;;  %v2959_v2 = vadd.f32 %v425_v62, %v308_v56 }
 0x11d   : > { %v450_v5 = vmax.f32 %v2959_v2, 0.0  ;;  %v646_v6 = vpack.c.bf16 %v452_v1, %v451_v0 }
 0x11f   : > { %2288 = vmatprep.subr.bf16.mxu0 %v646_v6  ;;  %v645_v9 = vpack.c.bf16 %v450_v5, %v449_v4 }
 0x120   : > { %2289 = vmatpush3.bf16.msra.mxu0 %v646_v6 }
 0x121   : > { %2290 = vmatprep.subr.bf16.mxu0 %v645_v9 }
 0x124   : > { %2291 = vmatpush3.bf16.msra.mxu0 %v645_v9 }
 0x125   : > { %2292 = vmatprep.subr.bf16.mxu0 %v644_v14 }
 0x128   : > { %2293 = vmatpush3.bf16.msra.mxu0 %v644_v14 }
 0x129   : > { %2294 = vmatprep.subr.bf16.mxu0 %v643_v20 }
 0x12c   : > { %2295 = vmatpush3.bf16.msra.mxu0 %v643_v20 }
 0x12d   : > { %2296 = vmatprep.subr.bf16.mxu0 %v642_v27 }
 0x130   : > { %2297 = vmatpush3.bf16.msra.mxu0 %v642_v27 }
 0x131   : > { %2298 = vmatprep.subr.bf16.mxu0 %v641_v33 }
 0x134   : > { %2299 = vmatpush3.bf16.msra.mxu0 %v641_v33 }
 0x135   : > { %2300 = vmatprep.subr.bf16.mxu0 %v640_v38 }
 0x138   : > { %2301 = vmatpush3.bf16.msra.mxu0 %v640_v38 }
 0x139   : > { %2302 = vmatprep.subr.bf16.mxu0 %v639_v40 }
 0x13c   : > { %2303 = vmatpush3.bf16.msra.mxu0 %v639_v40 }
 0x13f   : > { %2305 = vmatmul.mubr.bf16.vlgmr.msra.gmra.mxu0 %v3001_v41 }
 0x140   : > { %2308 = vmatprep.mubr.bf16.mxu0 %v3004_v37 }
 0x147   : > { %2309 = vmatmul.mubr.bf16.gmra.mxu0 %v3009_v42 }
 0x148   : > { %2312 = vmatprep.mubr.bf16.mxu0 %v3012_v43 }
 0x14f   : > { %2313 = vmatmul.mubr.bf16.gmra.mxu0 %v3017_v44 }
 0x150   : > { %2316 = vmatprep.mubr.bf16.mxu0 %v3020_v45 }
 0x157   : > { %2317 = vmatmul.mubr.bf16.gmra.mxu0 %v3025_v46 }
 0x158   : > { %2356 = vmatprep.mubr.bf16.mxu0 %v2916_v32 }
 0x172   : > { %v3040_v20 = vpop.f32.mrf.mxu1 }
 0x174   : > { %v3042_v21 = vpop.f32.mrf.mxu1 }
 0x176   : > { %v3044_v26 = vpop.f32.mrf.mxu1 }
 0x178   : > { %v3046_v27 = vpop.f32.mrf.mxu1 }
 0x17a   : > { %v2278_v29 = vpop.f32.mrf.mxu1 }
 0x17c   : > { %v3048_v30 = vpop.f32.mrf.mxu1 }
 0x17e   : > { %v2279_v33 = vpop.f32.mrf.mxu1 }
 0x180   : > { %v559_v34 = vpop.f32.mrf.mxu1 }
 0x182   : > { %v2282_v36 = vpop.f32.mrf.mxu1 }
 0x184   : > { %v572_v38 = vpop.f32.mrf.mxu1 }
 0x186   : > { %v2283_v39 = vpop.f32.mrf.mxu1 }
 0x188   : > { %v575_v40 = vpop.f32.mrf.mxu1 }
 0x1ff   : > { %v2306_v47 = vpop.f32.mrf.mxu0 }
 0x201   : > { %v729_v48 = vpop.f32.mrf.mxu0 }
 0x203   : > { %v2307_v49 = vpop.f32.mrf.mxu0 }
 0x204   : > { %v793_v55 = vpack.c.bf16 %v2307_v49, %v2306_v47  ;;  %v2286_v47 = vpop.f32.mrf.mxu1 }
 0x205   : > { %v732_v52 = vpop.f32.mrf.mxu0 }
 0x206   : > { %v792_v54 = vpack.c.bf16 %v732_v52, %v729_v48  ;;  %v588_v48 = vpop.f32.mrf.mxu1 }
 0x207   : > { %v2310_v56 = vpop.f32.mrf.mxu0 }
 0x208   : > { %2324 = vmatprep.mubr.msk.bf16.mxu1 %vm812_vm3, %v792_v54  ;;  %v2287_v49 = vpop.f32.mrf.mxu1 }
 0x209   : > { %v745_v57 = vpop.f32.mrf.mxu0  ;;  %2325 = vmatmul.mubr.msk.bf16.vlgmr.msra.gmra.mxu1 %vm812_vm3, %v793_v55 }
 0x20a   : > { %2373 = vmatpush3.bf16.msra.mxu1 %v2934_v50  ;;  %v591_v52 = vpop.f32.mrf.mxu1 }
 0x20b   : > { %v2311_v59 = vpop.f32.mrf.mxu0  ;;  %2374 = vmatprep.subr.bf16.mxu1 %v2939_v51  ;;  %v616_v23 = vadd.f32 %v591_v52, %v2959_v2 }
 0x20c   : > { %v795_v1 = vpack.c.bf16 %v2311_v59, %v2310_v56 }
 0x20d   : > { %v748_v62 = vpop.f32.mrf.mxu0 }
 0x20e   : > { %v794_v0 = vpack.c.bf16 %v748_v62, %v745_v57  ;;  %2375 = vmatpush3.bf16.msra.mxu1 %v2939_v51 }
 0x20f   : > { %v2314_v4 = vpop.f32.mrf.mxu0 }
 0x210   : > { %2328 = vmatprep.mubr.msk.bf16.mxu1 %vm812_vm3, %v794_v0 }
 0x211   : > { %v761_v5 = vpop.f32.mrf.mxu0  ;;  %2329 = vmatmul.mubr.msk.bf16.gmra.mxu1 %vm812_vm3, %v795_v1 }
 0x213   : > { %v2315_v6 = vpop.f32.mrf.mxu0 }
 0x214   : > { %v797_v10 = vpack.c.bf16 %v2315_v6, %v2314_v4  ;;  %v287_v4 = vld [vmem:[%s3414_s2 + $0xa8] sm:$0x1] }
 0x215   : > { %v764_v7 = vpop.f32.mrf.mxu0 }
 0x216   : > { %v796_v9 = vpack.c.bf16 %v764_v7, %v761_v5  ;;  %v288_v7 = vunpack.c.l.bf16 %v287_v4  ;;  %v613_v4 = vadd.f32 %v2282_v36, %v2961_v3  ;;  %v611_v36 = vadd.f32 %v572_v38, %v2969_v11 }
 0x217   : > { %v2318_v13 = vpop.f32.mrf.mxu0  ;;  %v609_v38 = vadd.f32 %v2278_v29, %v2974_v15  ;;  %v607_v15 = vadd.f32 %v3048_v30, %v2981_v24  ;;  %v605_v24 = vadd.f32 %v3040_v20, %v2987_v28  ;;  %v603_v28 = vadd.f32 %v3042_v21, %v2996_v35 }
 0x218   : > { %2332 = vmatprep.mubr.msk.bf16.mxu1 %vm812_vm3, %v796_v9 }
 0x219   : > { %v777_v50 = vpop.f32.mrf.mxu0  ;;  %2333 = vmatmul.mubr.msk.bf16.gmra.mxu1 %vm812_vm3, %v797_v10  ;;  %v617_v10 = vadd.f32 %v2286_v47, %v2947_v58  ;;  %v612_v47 = vadd.f32 %v575_v40, %v2966_v8 }
 0x21b   : > { %v2319_v14 = vpop.f32.mrf.mxu0 }
 0x21c   : > { %v799_v17 = vpack.c.bf16 %v2319_v14, %v2318_v13  ;;  %v618_v14 = vadd.f32 %v2287_v49, %v2953_v61 }
 0x21d   : > { %v780_v16 = vpop.f32.mrf.mxu0 }
 0x21e   : > { %v798_v51 = vpack.c.bf16 %v780_v16, %v777_v50  ;;  %v615_v50 = vadd.f32 %v588_v48, %v2951_v60  ;;  %v3069_v16 = vrot.slane %v288_v7, %v2941_v53 }
 0x220   : > { %2336 = vmatprep.mubr.msk.bf16.mxu1 %vm812_vm3, %v798_v51  ;;  %v3074_v22 = vadd.f32 %v3069_v16, %v617_v10  ;;  %v3079_v60 = vadd.f32 %v3069_v16, %v615_v50  ;;  %v3082_v61 = vadd.f32 %v3069_v16, %v618_v14  ;;  %v3091_v3 = vadd.f32 %v3069_v16, %v616_v23 }
 0x221   : > { %2337 = vmatmul.mubr.msk.bf16.gmra.mxu1 %vm812_vm3, %v799_v17  ;;  %v614_v17 = vadd.f32 %v2283_v39, %v2955_v63  ;;  %v3095_v49 = vadd.f32 %v3069_v16, %v613_v4  ;;  %v610_v50 = vadd.f32 %v2279_v33, %v2971_v12  ;;  %v608_v12 = vadd.f32 %v559_v34, %v2978_v18 }
 0x222   : > { %v3117_v29 = vadd.f32 %v3069_v16, %v609_v38  ;;  %v606_v18 = vadd.f32 %v3044_v26, %v2983_v25  ;;  %v3129_v30 = vadd.f32 %v3069_v16, %v607_v15  ;;  %v604_v25 = vadd.f32 %v3046_v27, %v2992_v31 }
 0x223   : > { %v3086_v63 = vadd.f32 %v3069_v16, %v614_v17  ;;  %v3106_v17 = vadd.f32 %v3069_v16, %v611_v36  ;;  %v3111_v33 = vadd.f32 %v3069_v16, %v610_v50  ;;  %v3143_v20 = vadd.f32 %v3069_v16, %v605_v24 }
 0x224   : > { %v3136_v26 = vadd.f32 %v3069_v16, %v606_v18  ;;  %v3150_v27 = vadd.f32 %v3069_v16, %v604_v25 }
 0x2c9   : > { %v3050_v54 = vpop.f32.mrf.mxu1 }
 0x2ca   : > { %v936_v31 = vadd.f32 %v3050_v54, %v3143_v20 }
 0x2cb   : > { %v3052_v55 = vpop.f32.mrf.mxu1 }
 0x2cd   : > { %v3054_v56 = vpop.f32.mrf.mxu1 }
 0x2cf   : > { %v3056_v57 = vpop.f32.mrf.mxu1 }
 0x2d0   : > { %v935_v21 = vadd.f32 %v3056_v57, %v3150_v27 }
 0x2d1   : > { %v2330_v59 = vpop.f32.mrf.mxu1 }
 0x2d2   : > { %v940_v34 = vadd.f32 %v2330_v59, %v3117_v29 }
 0x2d3   : > { %v3058_v62 = vpop.f32.mrf.mxu1 }
 0x2d4   : > { %v956_v59 = vmax.f32 %v940_v34, 0.0 }
 0x2d5   : > { %v2331_v0 = vpop.f32.mrf.mxu1 }
 0x2d7   : > { %v3060_v1 = vpop.f32.mrf.mxu1 }
 0x2d9   : > { %v2334_v5 = vpop.f32.mrf.mxu1 }
 0x2da   : > { %v944_v23 = vadd.f32 %v2334_v5, %v3095_v49 }
 0x2db   : > { %v903_v6 = vpop.f32.mrf.mxu1 }
 0x2dc   : > { %v960_v5 = vmax.f32 %v944_v23, 0.0 }
 0x2dd   : > { %v2335_v9 = vpop.f32.mrf.mxu1 }
 0x2de   : > { %v945_v7 = vadd.f32 %v2335_v9, %v3086_v63 }
 0x2df   : > { %v906_v13 = vpop.f32.mrf.mxu1 }
 0x2e0   : > { %v961_v9 = vmax.f32 %v945_v7, 0.0  ;;  %v938_v7 = vadd.f32 %v3058_v62, %v3129_v30 }
 0x2e1   : > { %v2338_v51 = vpop.f32.mrf.mxu1 }
 0x2e2   : > { %v948_v58 = vadd.f32 %v2338_v51, %v3074_v22  ;;  %v954_v62 = vmax.f32 %v938_v7, 0.0 }
 0x2e3   : > { %v919_v19 = vpop.f32.mrf.mxu1 }
 0x2e4   : > { %v946_v2 = vadd.f32 %v919_v19, %v3079_v60  ;;  %v964_v8 = vmax.f32 %v948_v58, 0.0  ;;  %v3101_v19 = vadd.f32 %v3069_v16, %v612_v47  ;;  %v942_v47 = vadd.f32 %v903_v6, %v3106_v17 }
 0x2e5   : > { %v2339_v48 = vpop.f32.mrf.mxu1 }
 0x2e6   : > { %v949_v39 = vadd.f32 %v2339_v48, %v3082_v61  ;;  %v962_v14 = vmax.f32 %v946_v2, 0.0  ;;  %v943_v4 = vadd.f32 %v906_v13, %v3101_v19  ;;  %v941_v13 = vadd.f32 %v2331_v0, %v3111_v33 }
 0x2e7   : > { %v922_v52 = vpop.f32.mrf.mxu1  ;;  %v971_v48 = vpack.c.bf16 %v961_v9, %v960_v5  ;;  %v958_v6 = vmax.f32 %v942_v47, 0.0 }
 0x2e8   : > { %v965_v40 = vmax.f32 %v949_v39, 0.0  ;;  %v947_v10 = vadd.f32 %v922_v52, %v3091_v3  ;;  %v959_v2 = vmax.f32 %v943_v4, 0.0  ;;  %v3124_v39 = vadd.f32 %v3069_v16, %v608_v12 }
 0x2e9   : > { %v957_v0 = vmax.f32 %v941_v13, 0.0 }
 0x2ea   : > { %v973_v51 = vpack.c.bf16 %v965_v40, %v964_v8  ;;  %v963_v11 = vmax.f32 %v947_v10, 0.0  ;;  %v939_v36 = vadd.f32 %v3060_v1, %v3124_v39  ;;  %v970_v52 = vpack.c.bf16 %v959_v2, %v958_v6 }
 0x2eb   : > { %v937_v1 = vadd.f32 %v3054_v56, %v3136_v26  ;;  %v969_v8 = vpack.c.bf16 %v957_v0, %v956_v59  ;;  %v3153_v10 = vadd.f32 %v3069_v16, %v603_v28  ;;  %v952_v56 = vmax.f32 %v936_v31, 0.0 }
 0x2ec   : > { %v972_v58 = vpack.c.bf16 %v963_v11, %v962_v14  ;;  %2340 = vmatprep.subr.bf16.mxu0 %v973_v51  ;;  %v955_v40 = vmax.f32 %v939_v36, 0.0  ;;  %v951_v14 = vmax.f32 %v935_v21, 0.0 }
 0x2ed   : > { %2341 = vmatpush3.bf16.msra.mxu0 %v973_v51  ;;  %v953_v35 = vmax.f32 %v937_v1, 0.0  ;;  %v934_v23 = vadd.f32 %v3052_v55, %v3153_v10 }
 0x2ee   : > { %2342 = vmatprep.subr.bf16.mxu0 %v972_v58  ;;  %v968_v50 = vpack.c.bf16 %v955_v40, %v954_v62 }
 0x2ef   : > { %v967_v54 = vpack.c.bf16 %v953_v35, %v952_v56  ;;  %v950_v51 = vmax.f32 %v934_v23, 0.0 }
 0x2f1   : > { %2343 = vmatpush3.bf16.msra.mxu0 %v972_v58  ;;  %v966_v11 = vpack.c.bf16 %v951_v14, %v950_v51 }
 0x2f2   : > { %2344 = vmatprep.subr.bf16.mxu0 %v971_v48 }
 0x2f5   : > { %2345 = vmatpush3.bf16.msra.mxu0 %v971_v48 }
 0x2f6   : > { %2346 = vmatprep.subr.bf16.mxu0 %v970_v52 }
 0x2f9   : > { %2347 = vmatpush3.bf16.msra.mxu0 %v970_v52 }
 0x2fa   : > { %2348 = vmatprep.subr.bf16.mxu0 %v969_v8 }
 0x2fd   : > { %2349 = vmatpush3.bf16.msra.mxu0 %v969_v8 }
 0x2fe   : > { %2350 = vmatprep.subr.bf16.mxu0 %v968_v50 }
 0x301   : > { %2351 = vmatpush3.bf16.msra.mxu0 %v968_v50 }
 0x302   : > { %2352 = vmatprep.subr.bf16.mxu0 %v967_v54 }
 0x305   : > { %2353 = vmatpush3.bf16.msra.mxu0 %v967_v54 }
 0x306   : > { %2354 = vmatprep.subr.bf16.mxu0 %v966_v11 }
 0x309   : > { %2355 = vmatpush3.bf16.msra.mxu0 %v966_v11 }
 0x30c   : > { %2357 = vmatmul.mubr.bf16.vlgmr.msra.gmra.mxu0 %v3001_v41 }
 0x30d   : > { %2360 = vmatprep.mubr.bf16.mxu0 %v3004_v37 }
 0x314   : > { %2361 = vmatmul.mubr.bf16.gmra.mxu0 %v3009_v42 }
 0x315   : > { %2364 = vmatprep.mubr.bf16.mxu0 %v3012_v43 }
 0x31c   : > { %2365 = vmatmul.mubr.bf16.gmra.mxu0 %v3017_v44 }
 0x31d   : > { %2368 = vmatprep.mubr.bf16.mxu0 %v3020_v45 }
 0x324   : > { %2369 = vmatmul.mubr.bf16.gmra.mxu0 %v3025_v46 }
 0x325   : > { %2408 = vmatprep.mubr.bf16.mxu0 %v2916_v32 }
 0x3cc   : > { %v2358_v55 = vpop.f32.mrf.mxu0 }
 0x3ce   : > { %v1008_v57 = vpop.f32.mrf.mxu0 }
 0x3d0   : > { %v2359_v16 = vpop.f32.mrf.mxu0 }
 0x3d1   : > { %v1072_v4 = vpack.c.bf16 %v2359_v16, %v2358_v55 }
 0x3d2   : > { %v1011_v38 = vpop.f32.mrf.mxu0 }
 0x3d3   : > { %v1071_v9 = vpack.c.bf16 %v1011_v38, %v1008_v57 }
 0x3d4   : > { %v2362_v58 = vpop.f32.mrf.mxu0 }
 0x3d5   : > { %2376 = vmatprep.mubr.msk.bf16.mxu1 %vm812_vm3, %v1071_v9 }
 0x3d6   : > { %v1024_v12 = vpop.f32.mrf.mxu0  ;;  %2377 = vmatmul.mubr.msk.bf16.vlgmr.msra.gmra.mxu1 %vm812_vm3, %v1072_v4 }
 0x3d8   : > { %v2363_v5 = vpop.f32.mrf.mxu0 }
 0x3d9   : > { %v1074_v13 = vpack.c.bf16 %v2363_v5, %v2362_v58 }
 0x3da   : > { %v1027_v47 = vpop.f32.mrf.mxu0 }
 0x3db   : > { %v1073_v15 = vpack.c.bf16 %v1027_v47, %v1024_v12 }
 0x3dc   : > { %v2366_v48 = vpop.f32.mrf.mxu0 }
 0x3dd   : > { %2380 = vmatprep.mubr.msk.bf16.mxu1 %vm812_vm3, %v1073_v15 }
 0x3de   : > { %v1040_v32 = vpop.f32.mrf.mxu0  ;;  %2381 = vmatmul.mubr.msk.bf16.gmra.mxu1 %vm812_vm3, %v1074_v13 }
 0x3e0   : > { %v2367_v2 = vpop.f32.mrf.mxu0 }
 0x3e1   : > { %v1076_v6 = vpack.c.bf16 %v2367_v2, %v2366_v48 }
 0x3e2   : > { %v1043_v18 = vpop.f32.mrf.mxu0 }
 0x3e3   : > { %v1075_v34 = vpack.c.bf16 %v1043_v18, %v1040_v32 }
 0x3e4   : > { %v2370_v24 = vpop.f32.mrf.mxu0 }
 0x3e5   : > { %2384 = vmatprep.mubr.msk.bf16.mxu1 %vm812_vm3, %v1075_v34 }
 0x3e6   : > { %v1056_v0 = vpop.f32.mrf.mxu0  ;;  %2385 = vmatmul.mubr.msk.bf16.gmra.mxu1 %vm812_vm3, %v1076_v6 }
 0x3e8   : > { %v2371_v36 = vpop.f32.mrf.mxu0 }
 0x3e9   : > { %v1078_v59 = vpack.c.bf16 %v2371_v36, %v2370_v24 }
 0x3ea   : > { %v1059_v52 = vpop.f32.mrf.mxu0 }
 0x3eb   : > { %v1077_v25 = vpack.c.bf16 %v1059_v52, %v1056_v0 }
 0x3ed   : > { %2388 = vmatprep.mubr.msk.bf16.mxu1 %vm812_vm3, %v1077_v25 }
 0x3ee   : > { %2389 = vmatmul.mubr.msk.bf16.gmra.mxu1 %vm812_vm3, %v1078_v59 }
 0x496   : > { %v2378_v7 = vpop.f32.mrf.mxu1 }
 0x497   : > { %v1202_v36 = vadd.f32 %v2378_v7, %v3143_v20  ;;  %v2643_v20 = vld [vmem:[%s3414_s2 + $0x30] sm:$0xff]  }
 0x498   : > { %v1137_v28 = vpop.f32.mrf.mxu1  ;;  %2424 = vmatprep.subr.bf16.mxu1 %v2643_v20 }
 0x499   : > { %2425 = vmatpush3.bf16.msra.mxu1 %v2643_v20 }
 0x49a   : > { %v2379_v1 = vpop.f32.mrf.mxu1 }
 0x49c   : > { %v1140_v8 = vpop.f32.mrf.mxu1 }
 0x49d   : > { %v1201_v25 = vadd.f32 %v1140_v8, %v3150_v27 }
 0x49e   : > { %v2382_v40 = vpop.f32.mrf.mxu1 }
 0x4a0   : > { %v1153_v31 = vpop.f32.mrf.mxu1 }
 0x4a1   : > { %v1204_v24 = vadd.f32 %v1153_v31, %v3129_v30  ;;  %v1217_v31 = vmax.f32 %v1201_v25, 0.0 }
 0x4a2   : > { %v2383_v62 = vpop.f32.mrf.mxu1 }
 0x4a3   : > { %v1220_v52 = vmax.f32 %v1204_v24, 0.0  ;;  %v2671_v24 = vld [vmem:[%s2859_s4 + $0x10] sm:$0xff] }
 0x4a4   : > { %v1156_v35 = vpop.f32.mrf.mxu1 }
 0x4a5   : > { %v1205_v34 = vadd.f32 %v1156_v35, %v3124_v39  ;;  %v1218_v39 = vmax.f32 %v1202_v36, 0.0 }
 0x4a6   : > { %v2386_v21 = vpop.f32.mrf.mxu1 }
 0x4a7   : > { %v1210_v12 = vadd.f32 %v2386_v21, %v3095_v49 }
 0x4a8   : > { %v1169_v50 = vpop.f32.mrf.mxu1 }
 0x4aa   : > { %v2387_v56 = vpop.f32.mrf.mxu1 }
 0x4ab   : > { %v1211_v38 = vadd.f32 %v2387_v56, %v3086_v63  ;;  %v1207_v63 = vadd.f32 %v2383_v62, %v3111_v33  ;;  %v1221_v33 = vmax.f32 %v1205_v34, 0.0  ;;  %v2669_v34 = vld [vmem:[%s2859_s4] sm:$0xff] }
 0x4ac   : > { %v1172_v23 = vpop.f32.mrf.mxu1 }
 0x4ad   : > { %v1227_v13 = vmax.f32 %v1211_v38, 0.0  ;;  %v1223_v18 = vmax.f32 %v1207_v63, 0.0  ;;  %v1234_v59 = vpack.c.bf16 %v1221_v33, %v1220_v52  ;;  %v2665_v63 = vld [vmem:[%s2859_s4 + $0x20] sm:$0xff] }
 0x4ae   : > { %v2390_v54 = vpop.f32.mrf.mxu1 }
 0x4af   : > { %v1214_v51 = vadd.f32 %v2390_v54, %v3074_v22  ;;  %v1209_v22 = vadd.f32 %v1172_v23, %v3101_v19 }
 0x4b0   : > { %v1185_v14 = vpop.f32.mrf.mxu1 }
 0x4b1   : > { %v1212_v55 = vadd.f32 %v1185_v14, %v3079_v60  ;;  %v1230_v9 = vmax.f32 %v1214_v51, 0.0  ;;  %v1226_v60 = vmax.f32 %v1210_v12, 0.0  ;;  %v1225_v2 = vmax.f32 %v1209_v22, 0.0  ;;  %v3428_v12 = vld [vmem:[#allocation6_spill] sm:$0xff] }
 0x4b2   : > { %v2391_v11 = vpop.f32.mrf.mxu1 }
 0x4b3   : > { %v1215_v57 = vadd.f32 %v2391_v11, %v3082_v61  ;;  %v1228_v5 = vmax.f32 %v1212_v55, 0.0  ;;  %v1208_v61 = vadd.f32 %v1169_v50, %v3106_v17  ;;  %v1237_v32 = vpack.c.bf16 %v1227_v13, %v1226_v60  ;;  %v2662_v13 = vld [vmem:[%s2859_s4 + $0x48] sm:$0xff]  ;;  %v2664_v60 = vld [vmem:[%s2859_s4 + $0x58] sm:$0xff] }
 0x4b4   : > { %v1188_v16 = vpop.f32.mrf.mxu1  ;;  %v1203_v17 = vadd.f32 %v2379_v1, %v3136_v26 }
 0x4b5   : > { %v1231_v4 = vmax.f32 %v1215_v57, 0.0  ;;  %v1213_v58 = vadd.f32 %v1188_v16, %v3091_v3  ;;  %v1206_v3 = vadd.f32 %v2382_v40, %v3117_v29  ;;  %v1224_v49 = vmax.f32 %v1208_v61, 0.0 }
 0x4b6   : > { %v1219_v29 = vmax.f32 %v1203_v17, 0.0  ;;  %v1200_v40 = vadd.f32 %v1137_v28, %v3153_v10  ;;  %v2672_v17 = vld [vmem:[%s2859_s4 + $0x18] sm:$0xff] }
 0x4b7   : > { %v1239_v47 = vpack.c.bf16 %v1231_v4, %v1230_v9  ;;  %v1229_v15 = vmax.f32 %v1213_v58, 0.0  ;;  %v1236_v19 = vpack.c.bf16 %v1225_v2, %v1224_v49  ;;  %v1222_v6 = vmax.f32 %v1206_v3, 0.0  ;;  %v3208_v9 = vld [vmem:[%s2859_s4 + $0x60] sm:$0xff]  ;;  %v2667_v3 = vld [vmem:[%s2859_s4 + $0x30] sm:$0xff]  ;;  %v2668_v49 = vld [vmem:[%s2859_s4 + $0x38] sm:$0xff] }
 0x4b8   : > { %v1233_v30 = vpack.c.bf16 %v1219_v29, %v1218_v39  ;;  %v1216_v26 = vmax.f32 %v1200_v40, 0.0  ;;  %v3427_v4 = vld [vmem:[#allocation5_spill] sm:$0xff] }
 0x4b9   : > { %v1238_v48 = vpack.c.bf16 %v1229_v15, %v1228_v5  ;;  %2392 = vmatprep.subr.bf16.mxu0 %v1239_v47  ;;  %v1235_v0 = vpack.c.bf16 %v1223_v18, %v1222_v6  ;;  %v2597_v58 = vpack.i.bf16 %v3427_v4, %v3208_v9  ;;  %v3429_v5 = vld [vmem:[#allocation7_spill] sm:$0xff]  ;;  %v3215_v15 = vld [vmem:[%s2859_s4 + $0x40] sm:$0xff]  ;;  %v2612_v18 = vpack.i.bf16 %v2668_v49, %v2667_v3 }
 0x4ba   : > { %2393 = vmatpush3.bf16.msra.mxu0 %v1239_v47  ;;  %v1232_v1 = vpack.c.bf16 %v1217_v31, %v1216_v26  ;;  %v2592_v47 = vpack.i.bf16 %v3429_v5, %v3428_v12  ;;  %v2607_v22 = vpack.i.bf16 %v2662_v13, %v3215_v15  ;;  %v2673_v5 = vld [vmem:[%s2859_s4 + $0x78] sm:$0xff] }
 0x4bb   : > { %2394 = vmatprep.subr.bf16.mxu0 %v1238_v48 }
 0x4be   : > { %2395 = vmatpush3.bf16.msra.mxu0 %v1238_v48  ;;  %v2663_v48 = vld [vmem:[%s2859_s4 + $0x50] sm:$0xff] }
 0x4bf   : > { %2396 = vmatprep.subr.bf16.mxu0 %v1237_v32  ;;  %v2602_v61 = vpack.i.bf16 %v2664_v60, %v2663_v48 }
 0x4c2   : > { %2397 = vmatpush3.bf16.msra.mxu0 %v1237_v32  ;;  %v2666_v32 = vld [vmem:[%s2859_s4 + $0x28] sm:$0xff] }
 0x4c3   : > { %2398 = vmatprep.subr.bf16.mxu0 %v1236_v19  ;;  %v2617_v2 = vpack.i.bf16 %v2666_v32, %v2665_v63 }
 0x4c6   : > { %2399 = vmatpush3.bf16.msra.mxu0 %v1236_v19  ;;  %v2670_v19 = vld [vmem:[%s2859_s4 + $0x8] sm:$0xff] }
 0x4c7   : > { %2400 = vmatprep.subr.bf16.mxu0 %v1235_v0  ;;  %v2627_v6 = vpack.i.bf16 %v2670_v19, %v2669_v34 }
 0x4ca   : > { %2401 = vmatpush3.bf16.msra.mxu0 %v1235_v0  ;;  %v2622_v0 = vpack.i.bf16 %v2672_v17, %v2671_v24 }
 0x4cb   : > { %2402 = vmatprep.subr.bf16.mxu0 %v1234_v59 }
 0x4ce   : > { %2403 = vmatpush3.bf16.msra.mxu0 %v1234_v59 }
 0x4cf   : > { %2404 = vmatprep.subr.bf16.mxu0 %v1233_v30 }
 0x4d2   : > { %2405 = vmatpush3.bf16.msra.mxu0 %v1233_v30 }
 0x4d3   : > { %2406 = vmatprep.subr.bf16.mxu0 %v1232_v1 }
 0x4d6   : > { %2407 = vmatpush3.bf16.msra.mxu0 %v1232_v1 }
 0x4d9   : > { %2409 = vmatmul.mubr.bf16.vlgmr.msra.gmra.mxu0 %v3001_v41  ;;  %v2644_v41 = vld [vmem:[%s3414_s2 + $0x28] sm:$0xff]  }
 0x4da   : > { %2412 = vmatprep.mubr.bf16.mxu0 %v3004_v37  ;;  %2426 = vmatprep.subr.bf16.mxu1 %v2644_v41  ;;  %v2645_v37 = vld [vmem:[%s3414_s2 + $0x20] sm:$0xff]  }
 0x4db   : > { %2427 = vmatpush3.bf16.msra.mxu1 %v2644_v41 }
 0x4dc   : > { %2428 = vmatprep.subr.bf16.mxu1 %v2645_v37 }
 0x4df   : > { %2429 = vmatpush3.bf16.msra.mxu1 %v2645_v37 }
 0x4e1   : > { %2413 = vmatmul.mubr.bf16.gmra.mxu0 %v3009_v42 }
 0x4e2   : > { %2416 = vmatprep.mubr.bf16.mxu0 %v3012_v43 }
 0x4e9   : > { %2417 = vmatmul.mubr.bf16.gmra.mxu0 %v3017_v44 }
 0x4ea   : > { %2420 = vmatprep.mubr.bf16.mxu0 %v3020_v45 }
 0x4f1   : > { %2421 = vmatmul.mubr.bf16.gmra.mxu0 %v3025_v46 }
 0x599   : > { %v2410_v42 = vpop.f32.mrf.mxu0 }
 0x59b   : > { %v1274_v43 = vpop.f32.mrf.mxu0 }
 0x59d   : > { %v2411_v44 = vpop.f32.mrf.mxu0 }
 0x59e   : > { %v2557_v45 = vpack.i.bf16 %v2411_v44, %v2410_v42 }
 0x59f   : > { %v1277_v46 = vpop.f32.mrf.mxu0 }
 0x5a0   : > { %v2552_v27 = vpack.i.bf16 %v1277_v46, %v1274_v43  ;;  %2558 = vrot.lane.b32.xlu1 %v2557_v45, %s2744_s15 }
 0x5a1   : > { %v2414_v10 = vpop.f32.mrf.mxu0 }
 0x5a2   : > { %2553 = vrot.lane.b32.xlu0 %v2552_v27, %s2744_s15 }
 0x5a3   : > { %v1290_v7 = vpop.f32.mrf.mxu0 }
 0x5a5   : > { %v2415_v28 = vpop.f32.mrf.mxu0 }
 0x5a6   : > { %v2567_v8 = vpack.i.bf16 %v2415_v28, %v2414_v10 }
 0x5a7   : > { %v1293_v62 = vpop.f32.mrf.mxu0 }
 0x5a8   : > { %v2562_v35 = vpack.i.bf16 %v1293_v62, %v1290_v7  ;;  %2568 = vrot.lane.b32.xlu1 %v2567_v8, %s2744_s15 }
 0x5a9   : > { %v2418_v21 = vpop.f32.mrf.mxu0 }
 0x5aa   : > { %2563 = vrot.lane.b32.xlu0 %v2562_v35, %s2744_s15 }
 0x5ab   : > { %v1306_v50 = vpop.f32.mrf.mxu0 }
 0x5ad   : > { %v2419_v56 = vpop.f32.mrf.mxu0 }
 0x5ae   : > { %v2577_v23 = vpack.i.bf16 %v2419_v56, %v2418_v21 }
 0x5af   : > { %v1309_v54 = vpop.f32.mrf.mxu0 }
 0x5b0   : > { %v2572_v14 = vpack.i.bf16 %v1309_v54, %v1306_v50  ;;  %2578 = vrot.lane.b32.xlu1 %v2577_v23, %s2744_s15 }
 0x5b1   : > { %v2422_v51 = vpop.f32.mrf.mxu0 }
 0x5b2   : > { %2573 = vrot.lane.b32.xlu0 %v2572_v14, %s2744_s15 }
 0x5b3   : > { %v1322_v11 = vpop.f32.mrf.mxu0 }
 0x5b5   : > { %v2423_v55 = vpop.f32.mrf.mxu0 }
 0x5b6   : > { %v2587_v57 = vpack.i.bf16 %v2423_v55, %v2422_v51 }
 0x5b7   : > { %v1325_v16 = vpop.f32.mrf.mxu0 }
 0x5b8   : > { %v2582_v38 = vpack.i.bf16 %v1325_v16, %v1322_v11  ;;  %2588 = vrot.lane.b32.xlu1 %v2587_v57, %s2744_s15 }
 0x5ba   : > { %2583 = vrot.lane.b32.xlu0 %v2582_v38, %s2744_s15 }
 0x5bc   : > { %2598 = vrot.lane.b32.xlu1 %v2597_v58, %s2745_s30 }
 0x5be   : > { %2593 = vrot.lane.b32.xlu0 %v2592_v47, %s2745_s30 }
 0x5c0   : > { %2608 = vrot.lane.b32.xlu1 %v2607_v22, %s2745_s30 }
 0x5c2   : > { %2603 = vrot.lane.b32.xlu0 %v2602_v61, %s2745_s30 }
 0x5c4   : > { %2618 = vrot.lane.b32.xlu1 %v2617_v2, %s2745_s30 }
 0x5c6   : > { %2613 = vrot.lane.b32.xlu0 %v2612_v18, %s2745_s30 }
 0x5c8   : > { %2628 = vrot.lane.b32.xlu1 %v2627_v6, %s2745_s30 }
 0x5ca   : > { %2623 = vrot.lane.b32.xlu0 %v2622_v0, %s2745_s30 }
 0x612   : > { %v2559_v33 = vpop.permute.xlu1 %2558 }
 0x613   : > { %v2561_v36 = vunpack.i.h.bf16 %v2559_v33  ;;  %v2560_v52 = vunpack.i.l.bf16 %v2559_v33 }
 0x614   : > { %v2554_v29 = vpop.permute.xlu0 %2553 }
 0x615   : > { %v2556_v25 = vunpack.i.h.bf16 %v2554_v29  ;;  %v2555_v59 = vunpack.i.l.bf16 %v2554_v29  ;;  %v1404_v39 = vsel %vm315_vm0, %v2672_v17, %v2561_v36  ;;  %v1403_v40 = vsel %vm315_vm0, %v2671_v24, %v2560_v52  ;;  %v289_v36 = vld [vmem:[%s3414_s2 + $0xb0] sm:$0x1] }
 0x616   : > { %v1418_v1 = vpack.c.bf16 %v1404_v39, %v1403_v40 }
 0x617   : > { %v1402_v30 = vsel %vm315_vm0, %v2670_v19, %v2556_v25  ;;  %v1401_v31 = vsel %vm315_vm0, %v2669_v34, %v2555_v59  ;;  %v290_v25 = vunpack.c.l.bf16 %v289_v36 }
 0x618   : > { %v1417_v26 = vpack.c.bf16 %v1402_v30, %v1401_v31 }
 0x619   : > { %v3291_v40 = vrot.slane %v290_v25, %v2941_v53 }
 0x61a   : > { %2430 = vmatprep.mubr.msk.bf16.mxu1 %vm1447_vm4, %v1417_v26  ;;  %v2569_v20 = vpop.permute.xlu1 %2568 }
 0x61b   : > { %v2571_v41 = vunpack.i.h.bf16 %v2569_v20  ;;  %v2570_v37 = vunpack.i.l.bf16 %v2569_v20  ;;  %2431 = vmatmul.mubr.msk.bf16.vlgmr.msra.gmra.mxu1 %vm1447_vm4, %v1418_v1 }
 0x61c   : > { %v2564_v42 = vpop.permute.xlu0 %2563 }
 0x61d   : > { %v2566_v43 = vunpack.i.h.bf16 %v2564_v42  ;;  %v2565_v44 = vunpack.i.l.bf16 %v2564_v42  ;;  %v1408_v45 = vsel %vm315_vm0, %v2668_v49, %v2571_v41  ;;  %v1407_v46 = vsel %vm315_vm0, %v2667_v3, %v2570_v37  ;;  %v2648_v3 = vld [vmem:[%s3414_s2 + $0x40] sm:$0xff]   ;;  %v2649_v49 = vld [vmem:[%s3414_s2 + $0x38] sm:$0xff]  }
 0x61e   : > { %v1420_v28 = vpack.c.bf16 %v1408_v45, %v1407_v46 }
 0x61f   : > { %v1406_v27 = vsel %vm315_vm0, %v2666_v32, %v2566_v43  ;;  %v1405_v10 = vsel %vm315_vm0, %v2665_v63, %v2565_v44  ;;  %v2746_v32 = vmov 0.0  }
 0x620   : > { %v1419_v7 = vpack.c.bf16 %v1406_v27, %v1405_v10  ;;  %2446 = vmatprep.subr.bf16.mxu0 %v2746_v32  ;;  %2466 = vmatprep.subr.bf16.mxu1 %v2746_v32 }
 0x621   : > { %2462 = vmatprep.mubr.msk.bf16.mxu0 %vm2747_vm5, %v2746_v32 }
 0x622   : > { %2434 = vmatprep.mubr.msk.bf16.mxu1 %vm1447_vm4, %v1419_v7  ;;  %v2579_v8 = vpop.permute.xlu1 %2578 }
 0x623   : > { %v2581_v62 = vunpack.i.h.bf16 %v2579_v8  ;;  %v2580_v35 = vunpack.i.l.bf16 %v2579_v8  ;;  %2435 = vmatmul.mubr.msk.bf16.gmra.mxu1 %vm1447_vm4, %v1420_v28 }
 0x624   : > { %v2574_v21 = vpop.permute.xlu0 %2573 }
 0x625   : > { %v2576_v50 = vunpack.i.h.bf16 %v2574_v21  ;;  %v2575_v56 = vunpack.i.l.bf16 %v2574_v21  ;;  %v1412_v23 = vsel %vm315_vm0, %v2664_v60, %v2581_v62  ;;  %v1411_v54 = vsel %vm315_vm0, %v2663_v48, %v2580_v35  ;;  %v2675_v48 = vld [vmem:[%s2859_s4 + $0x68] sm:$0xff] }
 0x626   : > { %v1422_v55 = vpack.c.bf16 %v1412_v23, %v1411_v54 }
 0x627   : > { %v1410_v14 = vsel %vm315_vm0, %v2662_v13, %v2576_v50  ;;  %v1409_v51 = vsel %vm315_vm0, %v3215_v15, %v2575_v56  ;;  %v2674_v13 = vld [vmem:[%s2859_s4 + $0x70] sm:$0xff] }
 0x628   : > { %v1421_v11 = vpack.c.bf16 %v1410_v14, %v1409_v51 }
 0x62a   : > { %2438 = vmatprep.mubr.msk.bf16.mxu1 %vm1447_vm4, %v1421_v11  ;;  %v2589_v57 = vpop.permute.xlu1 %2588 }
 0x62b   : > { %v2591_v16 = vunpack.i.h.bf16 %v2589_v57  ;;  %v2590_v38 = vunpack.i.l.bf16 %v2589_v57  ;;  %2439 = vmatmul.mubr.msk.bf16.gmra.mxu1 %vm1447_vm4, %v1422_v55 }
 0x62c   : > { %v2584_v4 = vpop.permute.xlu0 %2583 }
 0x62d   : > { %v2586_v58 = vunpack.i.h.bf16 %v2584_v4  ;;  %v2585_v12 = vunpack.i.l.bf16 %v2584_v4  ;;  %v1416_v47 = vsel %vm315_vm0, %v2673_v5, %v2591_v16  ;;  %v1415_v22 = vsel %vm315_vm0, %v2674_v13, %v2590_v38 }
 0x62e   : > { %v1424_v63 = vpack.c.bf16 %v1416_v47, %v1415_v22  ;;  %v2599_v45 = vpop.permute.xlu1 %2598 }
 0x62f   : > { %v1414_v15 = vsel %vm315_vm0, %v2675_v48, %v2586_v58  ;;  %v1413_v60 = vsel %vm315_vm0, %v3208_v9, %v2585_v12  ;;  %v2647_v9 = vld [vmem:[%s3414_s2 + $0x48] ss:$0 sps:$4 sm:$0xff]   ;;  %v2601_v27 = vunpack.i.h.bf16 %v2599_v45  ;;  %v2600_v8 = vunpack.i.l.bf16 %v2599_v45 }
 0x630   : > { %v1423_v61 = vpack.c.bf16 %v1414_v15, %v1413_v60  ;;  %v1745_v2 = vsel %vm502_vm1, %v2647_v9, 0  ;;  %v2594_v1 = vpop.permute.xlu0 %2593 }
 0x631   : > { %2467 = vmatpush3.bf16.msra.mxu1 %v1745_v2  ;;  %v2596_v20 = vunpack.i.h.bf16 %v2594_v1  ;;  %v2595_v37 = vunpack.i.l.bf16 %v2594_v1 }
 0x632   : > { %2442 = vmatprep.mubr.msk.bf16.mxu1 %vm1447_vm4, %v1423_v61  ;;  %2468 = vmatprep.subr.bf16.mxu1 %v2746_v32  ;;  %v2609_v58 = vpop.permute.xlu1 %2608 }
 0x633   : > { %2443 = vmatmul.mubr.msk.bf16.gmra.mxu1 %vm1447_vm4, %v1424_v63  ;;  %v2611_v5 = vunpack.i.h.bf16 %v2609_v58  ;;  %v2610_v48 = vunpack.i.l.bf16 %v2609_v58  ;;  %v2653_v58 = vld [vmem:[%s3414_s2 + $0x60] sm:$0xff]  }
 0x634   : > { %2472 = vmatprep.mubr.msk.bf16.mxu1 %vm2747_vm5, %v2746_v32  ;;  %v2604_v23 = vpop.permute.xlu0 %2603 }
 0x635   : > { %2469 = vmatpush3.bf16.msra.mxu1 %v2648_v3  ;;  %v2606_v14 = vunpack.i.h.bf16 %v2604_v23  ;;  %v2605_v57 = vunpack.i.l.bf16 %v2604_v23  ;;  %v2646_v23 = vld [vmem:[%s3414_s2 + $0xd0] sm:$0xff]  }
 0x636   : > { %2470 = vmatprep.subr.bf16.mxu1 %v2746_v32  ;;  %v2619_v25 = vpop.permute.xlu1 %2618 }
 0x637   : > { %v2620_v1 = vunpack.i.l.bf16 %v2619_v25 }
 0x638   : > { %v2614_v63 = vpop.permute.xlu0 %2613 }
 0x639   : > { %2471 = vmatpush3.bf16.msra.mxu1 %v2649_v49  ;;  %v2616_v2 = vunpack.i.h.bf16 %v2614_v63  ;;  %v2615_v36 = vunpack.i.l.bf16 %v2614_v63 }
 0x63a   : > { %2492 = vmatprep.subr.bf16.mxu1 %v2746_v32 }
 0x6db   : > { %v3277_v18 = vpop.f32.mrf.mxu1 }
 0x6dd   : > { %v3279_v34 = vpop.f32.mrf.mxu1 }
 0x6df   : > { %v3281_v19 = vpop.f32.mrf.mxu1 }
 0x6e1   : > { %v3283_v6 = vpop.f32.mrf.mxu1 }
 0x6e3   : > { %v2436_v24 = vpop.f32.mrf.mxu1 }
 0x6e4   : > { %v1531_v15 = vadd.f32 %v2436_v24, %v3291_v40 }
 0x6e5   : > { %v3285_v17 = vpop.f32.mrf.mxu1 }
 0x6e7   : > { %v2437_v0 = vpop.f32.mrf.mxu1 }
 0x6e8   : > { %v1534_v47 = vadd.f32 %v2437_v0, %v3291_v40 }
 0x6e9   : > { %v1525_v33 = vpop.f32.mrf.mxu1 }
 0x6ea   : > { %v1576_v3 = vmax.f32 %v1534_v47, 0.0  ;;  %v1526_v49 = vadd.f32 %v1525_v33, %v3291_v40  ;;  %v2656_v47 = vld [vmem:[%s3414_s2 + $0x98] sm:$0x7f]  }
 0x6eb   : > { %v2440_v52 = vpop.f32.mrf.mxu1 }
 0x6ec   : > { %v1547_v62 = vadd.f32 %v2440_v52, %v3291_v40  ;;  %v1575_v52 = vmax.f32 %v1531_v15, 0.0  ;;  %v1656_v33 = vsel %vm812_vm3, %v1576_v3, %v2616_v2 }
 0x6ed   : > { %v1538_v29 = vpop.f32.mrf.mxu1 }
 0x6ee   : > { %v1579_v16 = vmax.f32 %v1547_v62, 0.0  ;;  %v1539_v38 = vadd.f32 %v1538_v29, %v3291_v40  ;;  %v1523_v29 = vadd.f32 %v3285_v17, %v3291_v40  ;;  %v1655_v17 = vsel %vm812_vm3, %v1575_v52, %v2615_v36 }
 0x6ef   : > { %v2441_v59 = vpop.f32.mrf.mxu1 }
 0x6f0   : > { %v1550_v10 = vadd.f32 %v2441_v59, %v3291_v40  ;;  %v1659_v60 = vsel %vm812_vm3, %v1579_v16, %v2605_v57  ;;  %v1577_v61 = vmax.f32 %v1539_v38, 0.0 }
 0x6f1   : > { %v1541_v39 = vpop.f32.mrf.mxu1 }
 0x6f2   : > { %v1580_v51 = vmax.f32 %v1550_v10, 0.0  ;;  %v1542_v11 = vadd.f32 %v1541_v39, %v3291_v40  ;;  %v1657_v24 = vsel %vm812_vm3, %v1577_v61, %v2610_v48  ;;  %v2621_v39 = vunpack.i.h.bf16 %v2619_v25  ;;  %v2629_v10 = vpop.permute.xlu1 %2628  ;;  %v2657_v25 = vld [vmem:[%s3414_s2 + $0x90] sm:$0xff]  }
 0x6f3   : > { %v2444_v30 = vpop.f32.mrf.mxu1 }
 0x6f4   : > { %v1563_v31 = vadd.f32 %v2444_v30, %v3291_v40  ;;  %v1660_v13 = vsel %vm812_vm3, %v1580_v51, %v2606_v14  ;;  %v1578_v22 = vmax.f32 %v1542_v11, 0.0  ;;  %v1518_v30 = vadd.f32 %v3281_v19, %v3291_v40  ;;  %v2651_v51 = vld [vmem:[%s3414_s2 + $0x70] sm:$0xff]   ;;  %v2652_v11 = vld [vmem:[%s3414_s2 + $0x68] sm:$0xff]  }
 0x6f5   : > { %v1554_v26 = vpop.f32.mrf.mxu1  ;;  %v1670_v9 = vpack.c.bf16 %v1660_v13, %v1659_v60  ;;  %v1510_v19 = vadd.f32 %v3283_v6, %v3291_v40  ;;  %v2748_v13 = vmov 65535   ;;  %v291_v60 = vld [vmem:[%s3414_s2 + $0xb8] sm:$0x1] }
 0x6f6   : > { %v1583_v42 = vmax.f32 %v1563_v31, 0.0  ;;  %v1555_v43 = vadd.f32 %v1554_v26, %v3291_v40  ;;  %v1658_v0 = vsel %vm812_vm3, %v1578_v22, %v2611_v5  ;;  %v1574_v31 = vmax.f32 %v1526_v49, 0.0  ;;  %v2655_v5 = vld [vmem:[%s3414_s2 + $0x50] sm:$0xff]  }
 0x6f7   : > { %v2445_v41 = vpop.f32.mrf.mxu1  ;;  %v1669_v59 = vpack.c.bf16 %v1658_v0, %v1657_v24  ;;  %v1515_v26 = vadd.f32 %v3277_v18, %v3291_v40  ;;  %v1507_v18 = vadd.f32 %v3279_v34, %v3291_v40  ;;  %v1570_v62 = vmax.f32 %v1510_v19, 0.0  ;;  %v295_v19 = vld [vmem:[%s3414_s2 + $0xc8] sm:$0x1] }
 0x6f8   : > { %v1566_v44 = vadd.f32 %v2445_v41, %v3291_v40  ;;  %v1663_v35 = vsel %vm812_vm3, %v1583_v42, %v2595_v37  ;;  %v1581_v21 = vmax.f32 %v1555_v43, 0.0  ;;  %v2624_v41 = vpop.permute.xlu0 %2623  ;;  %v1668_v37 = vpack.c.bf16 %v1656_v33, %v1655_v17 }
 0x6f9   : > { %v1557_v46 = vpop.f32.mrf.mxu1  ;;  %v2626_v42 = vunpack.i.h.bf16 %v2624_v41  ;;  %v1572_v43 = vmax.f32 %v1518_v30, 0.0  ;;  %v1571_v45 = vmax.f32 %v1515_v26, 0.0  ;;  %v1569_v6 = vmax.f32 %v1507_v18, 0.0  ;;  %v293_v30 = vld [vmem:[%s3414_s2 + $0xc0] sm:$0x1] }
 0x6fa   : > { %v1584_v7 = vmax.f32 %v1566_v44, 0.0  ;;  %v1558_v28 = vadd.f32 %v1557_v46, %v3291_v40  ;;  %v1661_v4 = vsel %vm812_vm3, %v1581_v21, %v2600_v8  ;;  %v1654_v44 = vsel %vm812_vm3, %v1574_v31, %v2621_v39  ;;  %v2659_v39 = vld [vmem:[%s3414_s2 + $0x80] sm:$0xff]  }
 0x6fb   : > { %v2625_v46 = vunpack.i.l.bf16 %v2624_v41  ;;  %v2631_v8 = vunpack.i.h.bf16 %v2629_v10  ;;  %v2630_v21 = vunpack.i.l.bf16 %v2629_v10  ;;  %v1915_v22 = vsel %vm1913_vm8, 4294967295, %v2748_v13 }
 0x6fc   : > { %v1664_v50 = vsel %vm812_vm3, %v1584_v7, %v2596_v20  ;;  %v1582_v56 = vmax.f32 %v1558_v28, 0.0  ;;  %v1573_v20 = vmax.f32 %v1523_v29, 0.0  ;;  %v1652_v28 = vsel %vm812_vm3, %v1572_v43, %v2626_v42 }
 0x6fd   : > { %v1672_v54 = vpack.c.bf16 %v1664_v50, %v1663_v35  ;;  %v1651_v35 = vsel %vm812_vm3, %v1571_v45, %v2625_v46  ;;  %v1650_v34 = vsel %vm812_vm3, %v1570_v62, %v2631_v8  ;;  %v1649_v40 = vsel %vm812_vm3, %v1569_v6, %v2630_v21 }
 0x6fe   : > { %v1662_v55 = vsel %vm812_vm3, %v1582_v56, %v2601_v27  ;;  %v1653_v27 = vsel %vm812_vm3, %v1573_v20, %v2620_v1  ;;  %v1666_v50 = vpack.c.bf16 %v1652_v28, %v1651_v35  ;;  %v1665_v56 = vpack.c.bf16 %v1650_v34, %v1649_v40 }
 0x6ff   : > { %2447 = vmatpush3.bf16.msra.mxu0 %v1672_v54  ;;  %v1671_v12 = vpack.c.bf16 %v1662_v55, %v1661_v4  ;;  %v1667_v7 = vpack.c.bf16 %v1654_v44, %v1653_v27  ;;  %v2650_v54 = vld [vmem:[%s3414_s2 + $0x78] sm:$0x1f]   ;;  %v1916_v48 = vsel %vm1914_vm9, %v1915_v22, 0  ;;  %v292_v61 = vunpack.c.l.bf16 %v291_v60 }
 0x700   : > { %2448 = vmatprep.subr.bf16.mxu0 %v2746_v32  ;;  %v1836_v14 = vsel %vm1834_vm6, %v2650_v54, 0  ;;  %v1918_v15 = vand.u32 %v2656_v47, %v1916_v48  ;;  %v294_v33 = vunpack.c.l.bf16 %v293_v30  ;;  %v296_v44 = vunpack.c.l.bf16 %v295_v19 }
 0x701   : > { %v1724_v63 = vrot.slane %v292_v61, %v2941_v53 }
 0x702   : > { %v1794_v31 = vrot.slane %v294_v33, %v2941_v53  ;;  %v1885_v45 = vrot.slane %v296_v44, %v2941_v53 }
 0x703   : > { %2449 = vmatpush3.bf16.msra.mxu0 %v1671_v12  ;;  %v2654_v12 = vld [vmem:[%s3414_s2 + $0x58] sm:$0xff]  }
 0x704   : > { %2450 = vmatprep.subr.bf16.mxu0 %v2746_v32 }
 0x707   : > { %2451 = vmatpush3.bf16.msra.mxu0 %v1670_v9 }
 0x708   : > { %2452 = vmatprep.subr.bf16.mxu0 %v2746_v32 }
 0x70b   : > { %2453 = vmatpush3.bf16.msra.mxu0 %v1669_v59  ;;  %v2658_v59 = vld [vmem:[%s3414_s2 + $0x88] sm:$0xff]  }
 0x70c   : > { %2454 = vmatprep.subr.bf16.mxu0 %v2746_v32 }
 0x70f   : > { %2455 = vmatpush3.bf16.msra.mxu0 %v1668_v37 }
 0x710   : > { %2456 = vmatprep.subr.bf16.mxu0 %v2746_v32 }
 0x713   : > { %2457 = vmatpush3.bf16.msra.mxu0 %v1667_v7 }
 0x714   : > { %2458 = vmatprep.subr.bf16.mxu0 %v2746_v32 }
 0x717   : > { %2459 = vmatpush3.bf16.msra.mxu0 %v1666_v50 }
 0x718   : > { %2460 = vmatprep.subr.bf16.mxu0 %v2746_v32 }
 0x71b   : > { %2461 = vmatpush3.bf16.msra.mxu0 %v1665_v56 }
 0x71c   : > { %2476 = vmatprep.subr.bf16.mxu0 %v2746_v32 }
 0x71e   : > { %2463 = vmatmul.mubr.bf16.vlgmr.msra.gmra.mxu0 %v2646_v23 }
 0x71f   : > { %2488 = vmatprep.mubr.msk.bf16.mxu0 %vm2747_vm5, %v2746_v32  ;;  %2477 = vmatpush3.bf16.msra.mxu0 %v1836_v14 }
 0x720   : > { %2478 = vmatprep.subr.bf16.mxu0 %v2746_v32 }
 0x723   : > { %2479 = vmatpush3.bf16.msra.mxu0 %v2651_v51 }
 0x724   : > { %2480 = vmatprep.subr.bf16.mxu0 %v2746_v32 }
 0x727   : > { %2481 = vmatpush3.bf16.msra.mxu0 %v2652_v11 }
 0x728   : > { %2482 = vmatprep.subr.bf16.mxu0 %v2746_v32 }
 0x72b   : > { %2483 = vmatpush3.bf16.msra.mxu0 %v2653_v58 }
 0x72c   : > { %2484 = vmatprep.subr.bf16.mxu0 %v2746_v32 }
 0x72f   : > { %2485 = vmatpush3.bf16.msra.mxu0 %v2654_v12 }
 0x730   : > { %2486 = vmatprep.subr.bf16.mxu0 %v2746_v32 }
 0x733   : > { %2487 = vmatpush3.bf16.msra.mxu0 %v2655_v5 }
 0x7de   : > { %v1713_v55 = vpop.f32.mrf.mxu0 }
 0x7e0   : > { %v2464_v57 = vpop.f32.mrf.mxu0 }
 0x7e2   : > { %v1716_v16 = vpop.f32.mrf.mxu0 }
 0x7e3   : > { %v1720_v38 = vpack.c.bf16 %v1716_v16, %v1713_v55 }
 0x7e4   : > { %v2465_v4 = vpop.f32.mrf.mxu0 }
 0x7e5   : > { %2473 = vmatmul.mubr.msk.bf16.vlgmr.msra.gmra.mxu1 %vm1740_vm7, %v1720_v38 }
 0x7e6   : > { %2500 = vmatprep.mubr.msk.bf16.mxu1 %vm2747_vm5, %v2746_v32  ;;  %2493 = vmatpush3.bf16.msra.mxu1 %v1918_v15 }
 0x7e7   : > { %2494 = vmatprep.subr.bf16.mxu1 %v2746_v32 }
 0x7ea   : > { %2495 = vmatpush3.bf16.msra.mxu1 %v2657_v25 }
 0x7eb   : > { %2496 = vmatprep.subr.bf16.mxu1 %v2746_v32 }
 0x7ee   : > { %2497 = vmatpush3.bf16.msra.mxu1 %v2658_v59 }
 0x7ef   : > { %2498 = vmatprep.subr.bf16.mxu1 %v2746_v32 }
 0x7f2   : > { %2499 = vmatpush3.bf16.msra.mxu1 %v2659_v39 }
 0x8a5   : > { %v1781_v9 = vpop.f32.mrf.mxu1 }
 0x8a6   : > { %v1782_v3 = vadd.f32 %v1781_v9, %v1724_v63 }
 0x8a7   : > { %v2474_v2 = vpop.f32.mrf.mxu1 }
 0x8a8   : > { %v1788_v52 = vmax.f32 %v1782_v3, 0.0 }
 0x8a9   : > { %v1784_v49 = vpop.f32.mrf.mxu1 }
 0x8aa   : > { %v1785_v0 = vadd.f32 %v1784_v49, %v1724_v63 }
 0x8ab   : > { %v2475_v36 = vpop.f32.mrf.mxu1 }
 0x8ac   : > { %v1789_v29 = vmax.f32 %v1785_v0, 0.0 }
 0x8ae   : > { %v1790_v24 = vpack.c.bf16 %v1789_v29, %v1788_v52 }
 0x8b0   : > { %2489 = vmatmul.mubr.msk.bf16.vlgmr.msra.gmra.mxu0 %vm1830_vm10, %v1790_v24 }
 0x970   : > { %v1872_v26 = vpop.f32.mrf.mxu0 }
 0x971   : > { %v1873_v17 = vadd.f32 %v1872_v26, %v1794_v31 }
 0x972   : > { %v2490_v1 = vpop.f32.mrf.mxu0 }
 0x973   : > { %v1879_v32 = vmax.f32 %v1873_v17, 0.0 }
 0x974   : > { %v1875_v20 = vpop.f32.mrf.mxu0 }
 0x975   : > { %v1876_v41 = vadd.f32 %v1875_v20, %v1794_v31 }
 0x976   : > { %v2491_v37 = vpop.f32.mrf.mxu0 }
 0x977   : > { %v1880_v42 = vmax.f32 %v1876_v41, 0.0 }
 0x979   : > { %v1881_v43 = vpack.c.bf16 %v1880_v42, %v1879_v32 }
 0x97b   : > { %2501 = vmatmul.mubr.msk.bf16.vlgmr.msra.gmra.mxu1 %vm1909_vm11, %v1881_v43 }
 0xa3b   : > { %v1954_v18 = vpop.f32.mrf.mxu1 }
 0xa3c   : > { %v1955_v46 = vadd.f32 %v1954_v18, %v1885_v45 }
 0xa3d   : > { %v2502_v27 = vpop.f32.mrf.mxu1 }
 0xa3e   : > { %1961 = vst [vmem:[%s210_s27] sm:$0xff] %v1955_v46 }
 0xa3f   : > { %v1957_v10 = vpop.f32.mrf.mxu1 }
 0xa40   : > { %v1958_v7 = vadd.f32 %v1957_v10, %v1885_v45 }
 0xa41   : > { %v2503_v28 = vpop.f32.mrf.mxu1 }
 0xa42   : > { %1962 = vst [vmem:[%s210_s27 + $0x8] sm:$0xff] %v1958_v7 }
 0xa43 PF: > { %p13_p1 = scmp.ge.s32.totalorder %s2791_s17, 4   ;;  %s3430_s12 = smov %s2730_s13 }
 0xa44   : > { %s3431_s13 = smov %s2734_s14  ;;  %s3432_s14 = smov %s2801_s20 }
 0xa45   : > { %s3433_s15 = smov %s2791_s17  ;;  %15 = sbr.rel (!%p13_p1) target bundleno = 3 (0x3), region = 75 }
 0xa4a   :  { %1985 = vsyncpa [#allocation3], 1 }
 0xa4b   :  { %1987 = vsyncpa [#allocation3 + $0x1], 1 }

</bundles_post_ra>
